<compile_context>
chip_gen: v7x
topology: tpu7x:2x2x1
jax: 0.10.0
libtpu: 0.0.40
codegen_flags: <defaults>
</compile_context>

<pallas_src>
import jax
import jax.numpy as jnp
from jax.experimental import pallas as pl
from jax.experimental.pallas import tpu as pltpu

LANE = 128


def _round_up(x, m):
    return ((x + m - 1) // m) * m


def _split_hi_lo(w):
    """f32 -> (bf16 hi, bf16 lo) split for bf16x3 matmuls (hi + lo ~= w)."""
    w = w.astype(jnp.float32)
    hi = w.astype(jnp.bfloat16)
    lo = (w - hi.astype(jnp.float32)).astype(jnp.bfloat16)
    return hi, lo


# ----------------------------------------------------------------------------
# Fused kernel: whole FNN forward on one batch tile.
# ----------------------------------------------------------------------------
def _make_fnn_kernel(*, depth, n_out, fout_pad, to_real):
    f32 = jnp.float32

    def split(x):
        hi = x.astype(jnp.bfloat16)
        lo = (x - hi.astype(f32)).astype(jnp.bfloat16)
        return hi, lo

    def mm3(x, wh, wl):
        # bf16x3 matmul: bf16 operands, f32 accumulation, explicit precision.
        xh, xl = split(x)
        return (jnp.dot(xh, wh, preferred_element_type=f32)
                + jnp.dot(xl, wh, preferred_element_type=f32)
                + jnp.dot(xh, wl, preferred_element_type=f32))

    def leaky(v):  # complex_leakyRelu applied to the [real | imag] columns
        return jnp.where(v >= 0, v, 0.01 * v)

    def kernel(*refs):
        if depth > 0:
            (ur_ref, ui_ref, w0h_ref, w0l_ref, b0_ref,
             wnh_ref, wnl_ref, bn_ref,
             w1h_ref, w1l_ref, b1_ref, add_ref, y_ref) = refs
        else:
            (ur_ref, ui_ref, w0h_ref, w0l_ref, b0_ref,
             w1h_ref, w1l_ref, b1_ref, add_ref, y_ref) = refs

        # fc0: h = u_real @ [wr^T|wi^T] + u_imag @ [-wi^T|wr^T] + b0
        # (the two blocks are stacked on axis 0 of w0*; no wrapper concat).
        h = (mm3(ur_ref[...], w0h_ref[0], w0l_ref[0])
             + mm3(ui_ref[...], w0h_ref[1], w0l_ref[1])
             + b0_ref[...])
        h = leaky(h)

        # Hidden layers: depth is a small static int -> keep the Python unroll
        # (full LLO scheduler visibility); activations stay in vregs/VMEM.
        for l in range(depth):
            h = leaky(mm3(h, wnh_ref[l], wnl_ref[l]) + bn_ref[l])

        # fc1 (no activation).
        y = mm3(h, w1h_ref[...], w1l_ref[...]) + b1_ref[...]

        if to_real:
            # |u|^2 = yr^2 + yi^2 via an XLU lane-roll; correct because all
            # padding columns of w1/b1/add_vec are exactly zero.
            y2 = y * y
            y = y2 + pltpu.roll(y2, shift=fout_pad - n_out, axis=1)

        # add_ref carries init_value on the real columns only (zeros elsewhere).
        y_ref[...] = y + add_ref[...]

    return kernel


# ----------------------------------------------------------------------------
# Parameter construction (mirrors complex_linear.__init__: randn/100).
# ----------------------------------------------------------------------------
def make_complex_linear_params(key, input_dim, output_dim):
    k0, k1, k2, k3 = jax.random.split(key, 4)
    return dict(
        wr=jax.random.normal(k0, (output_dim, input_dim), jnp.float32) / 100.0,
        wi=jax.random.normal(k1, (output_dim, input_dim), jnp.float32) / 100.0,
        br=jax.random.normal(k2, (output_dim,), jnp.float32) / 100.0,
        bi=jax.random.normal(k3, (output_dim,), jnp.float32) / 100.0,
    )


def make_fnn_params(key, input_features, out_features, width, depth):
    keys = jax.random.split(key, depth + 2)
    return {
        "fc0": make_complex_linear_params(keys[0], input_features, width),
        "net": [make_complex_linear_params(keys[1 + i], width, width)
                for i in range(depth)],
        "fc1": make_complex_linear_params(keys[depth + 1], width, out_features),
        "init_value": jnp.zeros((1,), jnp.float32),  # torch.zeros(1)
    }


def _block_weight(wr, wi, in_pad, out_pad):
    """wr, wi: [out, in] (PyTorch layout) -> padded [in_pad, out_pad] block
    [[wr^T, wi^T], [-wi^T, wr^T]] acting on concatenated [real | imag] rows."""
    n_o, n_i = wr.shape
    top = jnp.concatenate([wr.T, wi.T], axis=1)     # [in, 2*out]
    bot = jnp.concatenate([-wi.T, wr.T], axis=1)    # [in, 2*out]
    w = jnp.concatenate([top, bot], axis=0)         # [2*in, 2*out]
    return jnp.pad(w, ((0, in_pad - 2 * n_i), (0, out_pad - 2 * n_o)))


def _fc0_blocks(wr, wi, in_pad, out_pad):
    """Stacked [2, in_pad, out_pad]: block 0 applied to u_real, 1 to u_imag."""
    n_o, n_i = wr.shape
    a = jnp.pad(jnp.concatenate([wr.T, wi.T], axis=1),
                ((0, in_pad - n_i), (0, out_pad - 2 * n_o)))
    b = jnp.pad(jnp.concatenate([-wi.T, wr.T], axis=1),
                ((0, in_pad - n_i), (0, out_pad - 2 * n_o)))
    return jnp.stack([a, b])


def _block_bias(br, bi, out_pad):
    b = jnp.concatenate([br, bi])                   # [2*out]
    return jnp.pad(b, (0, out_pad - b.shape[0])).reshape(1, out_pad)


def pack_fnn_params(raw):
    """Build kernel-ready, lane-padded, bf16 hi/lo-split block weights."""
    n_in = raw["fc0"]["wr"].shape[1]
    width = raw["fc0"]["wr"].shape[0]
    n_out = raw["fc1"]["wr"].shape[0]
    depth = len(raw["net"])

    nin_p = _round_up(n_in, LANE)
    h_pad = _round_up(2 * width, LANE)
    fout_pad = _round_up(2 * n_out, LANE)
    # Roll-based |u|^2 relies on zero padding columns beyond 2*n_out.
    assert fout_pad >= 2 * n_out

    w0_hi, w0_lo = _split_hi_lo(
        _fc0_blocks(raw["fc0"]["wr"], raw["fc0"]["wi"], nin_p, h_pad))
    w1_hi, w1_lo = _split_hi_lo(
        _block_weight(raw["fc1"]["wr"], raw["fc1"]["wi"], h_pad, fout_pad))

    packed = {
        "dims": dict(n_in=n_in, width=width, n_out=n_out, depth=depth,
                     nin_p=nin_p, h_pad=h_pad, fout_pad=fout_pad),
        "w0_hi": w0_hi, "w0_lo": w0_lo,
        "b0": _block_bias(raw["fc0"]["br"], raw["fc0"]["bi"], h_pad),
        "w1_hi": w1_hi, "w1_lo": w1_lo,
        "b1": _block_bias(raw["fc1"]["br"], raw["fc1"]["bi"], fout_pad),
        # init_value folded into a real-columns-only add vector, built ONCE at
        # pack time (hoisted out of the per-call path); pad columns stay zero.
        "add_vec": jnp.zeros((1, fout_pad), jnp.float32)
                      .at[0, :n_out].set(raw["init_value"][0]),
    }
    if depth > 0:
        wn_hi, wn_lo = _split_hi_lo(jnp.stack(
            [_block_weight(p["wr"], p["wi"], h_pad, h_pad)
             for p in raw["net"]]))
        packed["wnet_hi"] = wn_hi
        packed["wnet_lo"] = wn_lo
        packed["bnet"] = jnp.stack(
            [_block_bias(p["br"], p["bi"], h_pad) for p in raw["net"]])
    return packed


# ----------------------------------------------------------------------------
# VMEM sizing.
# ----------------------------------------------------------------------------
def _weight_vmem_bytes(dims):
    nin_p, h_pad = dims["nin_p"], dims["h_pad"]
    fout_pad, depth = dims["fout_pad"], dims["depth"]
    bf16, f32 = 2, 4
    b = 2 * (2 * nin_p * h_pad) * bf16             # w0 hi + lo
    b += h_pad * f32                               # b0
    b += 2 * (depth * h_pad * h_pad) * bf16        # wnet hi + lo
    b += depth * h_pad * f32                       # bnet
    b += 2 * (h_pad * fout_pad) * bf16             # w1 hi + lo
    b += 2 * fout_pad * f32                        # b1 + add_vec
    return b


def _vmem_limit_bytes(dims, tile_m, *, weight_bufs):
    f32 = 4
    nin_p = dims["nin_p"]
    h_pad, fout_pad = dims["h_pad"], dims["fout_pad"]
    weights = weight_bufs * _weight_vmem_bytes(dims)
    io = 2 * (2 * tile_m * nin_p) * f32 + 2 * tile_m * fout_pad * f32
    act = 6 * tile_m * max(h_pad, fout_pad) * f32  # h + bf16 hi/lo temps + sums
    need = int(1.25 * (weights + io + act))        # ~20-25% headroom
    try:
        cap = int(pltpu.get_tpu_info().vmem_capacity_bytes)
    except Exception:
        cap = 64 * 1024 * 1024                     # v7x per-TC VMEM (fleet min)
    limit = min(max(need, 32 * 1024 * 1024), cap - 4 * 1024 * 1024)
    return max(limit, 16 * 1024 * 1024)


# ----------------------------------------------------------------------------
# pallas_call builder + fused forward pass.
# ----------------------------------------------------------------------------
def _fnn_pallas_call(packed, ur, ui, *, tile_m, n_tiles, m_pad, to_real,
                     dim_sem, single_buffer_weights):
    dims = packed["dims"]
    n_out, depth = dims["n_out"], dims["depth"]
    nin_p, h_pad, fout_pad = dims["nin_p"], dims["h_pad"], dims["fout_pad"]

    # Grid-invariant operands live at block (0, 0, ...) on every step: a single
    # VMEM buffer suffices (default double-buffering only doubles their VMEM).
    inv_kw = dict(pipeline_mode=pl.Buffered(1)) if single_buffer_weights else {}

    def inv(shape):
        if len(shape) == 2:
            return pl.BlockSpec(shape, lambda i: (0, 0), **inv_kw)
        return pl.BlockSpec(shape, lambda i: (0, 0, 0), **inv_kw)

    in_specs = [
        pl.BlockSpec((tile_m, nin_p), lambda i: (i, 0)),   # u_real tile
        pl.BlockSpec((tile_m, nin_p), lambda i: (i, 0)),   # u_imag tile
        inv((2, nin_p, h_pad)),                            # w0 hi
        inv((2, nin_p, h_pad)),                            # w0 lo
        inv((1, h_pad)),                                   # b0
    ]
    args = [ur, ui, packed["w0_hi"], packed["w0_lo"], packed["b0"]]
    if depth > 0:
        # TODO(synk): stream per-layer hidden weights from HBM (pl.ANY +
        # double-buffered make_async_copy) when they exceed ~20 MiB on v7x.
        in_specs += [inv((depth, h_pad, h_pad)),           # wnet hi
                     inv((depth, h_pad, h_pad)),           # wnet lo
                     inv((depth, 1, h_pad))]               # bnet
        args += [packed["wnet_hi"], packed["wnet_lo"], packed["bnet"]]
    in_specs += [inv((h_pad, fout_pad)),                   # w1 hi
                 inv((h_pad, fout_pad)),                   # w1 lo
                 inv((1, fout_pad)),                       # b1
                 inv((1, fout_pad))]                       # add_vec (init_value)
    args += [packed["w1_hi"], packed["w1_lo"], packed["b1"], packed["add_vec"]]

    return pl.pallas_call(
        _make_fnn_kernel(depth=depth, n_out=n_out, fout_pad=fout_pad,
                         to_real=to_real),
        out_shape=jax.ShapeDtypeStruct((m_pad, fout_pad), jnp.float32),
        grid_spec=pltpu.PrefetchScalarGridSpec(
            num_scalar_prefetch=0,
            grid=(n_tiles,),
            in_specs=in_specs,
            out_specs=pl.BlockSpec((tile_m, fout_pad), lambda i: (i, 0)),
        ),
        compiler_params=pltpu.CompilerParams(
            dimension_semantics=dim_sem,
            vmem_limit_bytes=_vmem_limit_bytes(
                dims, tile_m,
                weight_bufs=1 if single_buffer_weights else 2)),
    )(*args)


def fnn_forward(packed, u_real, u_imag, *, to_real=False, tile_m_max=256):
    """Fused FNN forward: one pallas_call for fc0 + hidden layers + fc1.

    tile_m_max: rows per grid step (256 default; sweep up to 512 on v6e for
    large compute-bound batches).
    """
    dims = packed["dims"]
    n_in, n_out, depth = dims["n_in"], dims["n_out"], dims["depth"]
    nin_p, h_pad, fout_pad = dims["nin_p"], dims["h_pad"], dims["fout_pad"]

    M = u_real.shape[0]

    # Bounded-waste batch tiling: <= 7 padded rows per tile.
    n_tiles = int(pl.cdiv(M, tile_m_max))
    tile_m = _round_up(int(pl.cdiv(M, n_tiles)), 8)
    m_pad = n_tiles * tile_m

    # No [real | imag] concat in the wrapper: one cheap pad per operand only.
    ur = jnp.pad(u_real.astype(jnp.float32),
                 ((0, m_pad - M), (0, nin_p - n_in)))
    ui = jnp.pad(u_imag.astype(jnp.float32),
                 ((0, m_pad - M), (0, nin_p - n_in)))

    # Megacore gating: "parallel" shards the batch grid across TensorCores but
    # each core re-reads the whole resident weight set from HBM; only enable it
    # when the MXU work clearly dominates that duplicated weight traffic.
    flops = 6 * m_pad * (2 * nin_p * h_pad + depth * h_pad * h_pad
                         + h_pad * fout_pad)       # bf16x3 => 3 MXU passes/layer
    use_parallel = (n_tiles >= 2
                    and flops >= 1024 * _weight_vmem_bytes(dims))
    dim_sem = ("parallel",) if use_parallel else ("arbitrary",)

    y = None
    last_err = None
    for single_buffer_weights in (True, False):
        try:
            y = _fnn_pallas_call(packed, ur, ui, tile_m=tile_m,
                                 n_tiles=n_tiles, m_pad=m_pad, to_real=to_real,
                                 dim_sem=dim_sem,
                                 single_buffer_weights=single_buffer_weights)
            y = jax.block_until_ready(y)
            break
        except Exception as e:  # Buffered(1) rejected -> double-buffered fallback
            last_err = e
            y = None
    if y is None:
        raise last_err

    if to_real:
        return y[:M, :n_out]
    return y[:M, :n_out] + 1j * y[:M, n_out:2 * n_out]


# ----------------------------------------------------------------------------
# Pure-JAX reference for correctness checking.
# ----------------------------------------------------------------------------
def fnn_forward_ref(raw, u_real, u_imag, *, to_real=False):
    def clin(p, u):
        w = p["wr"] + 1j * p["wi"]          # [out, in]
        b = p["br"] + 1j * p["bi"]
        return u @ w.T + b

    def cact(u):
        lr = lambda x: jnp.where(x >= 0, x, 0.01 * x)
        return lr(u.real) + 1j * lr(u.imag)

    u = u_real + 1j * u_imag
    u = cact(clin(raw["fc0"], u))
    for p in raw["net"]:
        u = cact(clin(p, u))
    u = clin(raw["fc1"], u)
    if to_real:
        u = jnp.abs(u) ** 2
    return u + raw["init_value"]


if __name__ == "__main__":
    # Small, module-consistent shapes: u is [batch, input_features].
    batch = 8
    input_features = 16
    out_features = 8
    width = 32          # config.meta_width
    depth = 2           # config.meta_depth

    key = jax.random.PRNGKey(0)
    kp, kr, ki = jax.random.split(key, 3)

    raw = make_fnn_params(kp, input_features, out_features, width, depth)
    packed = pack_fnn_params(raw)

    u_real = jax.random.normal(kr, (batch, input_features), jnp.float32)
    u_imag = jax.random.normal(ki, (batch, input_features), jnp.float32)

    # Complex output path.
    out = jax.block_until_ready(fnn_forward(packed, u_real, u_imag,
                                            to_real=False))
    ref = fnn_forward_ref(raw, u_real, u_imag, to_real=False)
    assert out.shape == (batch, out_features)
    assert jnp.allclose(out.real, ref.real, atol=1e-5, rtol=1e-5)
    assert jnp.allclose(out.imag, ref.imag, atol=1e-5, rtol=1e-5)

    # to_real=True path (|u|^2 + init_value computed inside the kernel).
    out_r = jax.block_until_ready(fnn_forward(packed, u_real, u_imag,
                                              to_real=True))
    ref_r = fnn_forward_ref(raw, u_real, u_imag, to_real=True)
    assert out_r.shape == (batch, out_features)
    assert jnp.allclose(out_r, ref_r, atol=1e-5, rtol=1e-5)

    print("KERNEL_OK")
</pallas_src>

<mosaic_0001>
module attributes {stable_mosaic.version = 11 : i64} {
  func.func @kernel(%arg0: i32, %arg1: memref<8x128xf32, #tpu.memory_space<vmem>>, %arg2: memref<8x128xf32, #tpu.memory_space<vmem>>, %arg3: memref<2x128x128xbf16, #tpu.memory_space<vmem>>, %arg4: memref<2x128x128xbf16, #tpu.memory_space<vmem>>, %arg5: memref<1x128xf32, #tpu.memory_space<vmem>>, %arg6: memref<2x128x128xbf16, #tpu.memory_space<vmem>>, %arg7: memref<2x128x128xbf16, #tpu.memory_space<vmem>>, %arg8: memref<2x1x128xf32, #tpu.memory_space<vmem>>, %arg9: memref<128x128xbf16, #tpu.memory_space<vmem>>, %arg10: memref<128x128xbf16, #tpu.memory_space<vmem>>, %arg11: memref<1x128xf32, #tpu.memory_space<vmem>>, %arg12: memref<1x128xf32, #tpu.memory_space<vmem>>, %arg13: memref<8x128xf32, #tpu.memory_space<vmem>>) attributes {dimension_semantics = [#tpu.dimension_semantics<arbitrary>], iteration_bounds = array<i64: 1>, scalar_prefetch = 0 : i64, scratch_operands = 0 : i64, tpu.core_type = #tpu.core_type<tc>, window_params = [{transform_indices = @transform_0, window_bounds = array<i64: 8, 128>}, {transform_indices = @transform_1, window_bounds = array<i64: 8, 128>}, {pipeline_mode = #tpu.pipeline_mode<synchronous>, transform_indices = @transform_2, window_bounds = array<i64: 2, 128, 128>}, {pipeline_mode = #tpu.pipeline_mode<synchronous>, transform_indices = @transform_3, window_bounds = array<i64: 2, 128, 128>}, {pipeline_mode = #tpu.pipeline_mode<synchronous>, transform_indices = @transform_4, window_bounds = array<i64: 1, 128>}, {pipeline_mode = #tpu.pipeline_mode<synchronous>, transform_indices = @transform_5, window_bounds = array<i64: 2, 128, 128>}, {pipeline_mode = #tpu.pipeline_mode<synchronous>, transform_indices = @transform_6, window_bounds = array<i64: 2, 128, 128>}, {pipeline_mode = #tpu.pipeline_mode<synchronous>, transform_indices = @transform_7, window_bounds = array<i64: 2, 1, 128>}, {pipeline_mode = #tpu.pipeline_mode<synchronous>, transform_indices = @transform_8, window_bounds = array<i64: 128, 128>}, {pipeline_mode = #tpu.pipeline_mode<synchronous>, transform_indices = @transform_9, window_bounds = array<i64: 128, 128>}, {pipeline_mode = #tpu.pipeline_mode<synchronous>, transform_indices = @transform_10, window_bounds = array<i64: 1, 128>}, {pipeline_mode = #tpu.pipeline_mode<synchronous>, transform_indices = @transform_11, window_bounds = array<i64: 1, 128>}, {transform_indices = @transform_12, window_bounds = array<i64: 8, 128>}]} {
    %c0 = arith.constant 0 : index
    %c0_0 = arith.constant 0 : index
    %0 = vector.load %arg1[%c0, %c0_0] : memref<8x128xf32, #tpu.memory_space<vmem>>, vector<8x128xf32>
    %c0_1 = arith.constant 0 : index
    %c0_2 = arith.constant 0 : index
    %c0_3 = arith.constant 0 : index
    %1 = vector.load %arg3[%c0_1, %c0_2, %c0_3] : memref<2x128x128xbf16, #tpu.memory_space<vmem>>, vector<1x128x128xbf16>
    %2 = vector.shape_cast %1 : vector<1x128x128xbf16> to vector<128x128xbf16>
    %c0_4 = arith.constant 0 : index
    %c0_5 = arith.constant 0 : index
    %c0_6 = arith.constant 0 : index
    %3 = vector.load %arg4[%c0_4, %c0_5, %c0_6] : memref<2x128x128xbf16, #tpu.memory_space<vmem>>, vector<1x128x128xbf16>
    %4 = vector.shape_cast %3 : vector<1x128x128xbf16> to vector<128x128xbf16>
    %5 = arith.truncf %0 : vector<8x128xf32> to vector<8x128xbf16>
    %6 = arith.extf %5 : vector<8x128xbf16> to vector<8x128xf32>
    %7 = arith.subf %0, %6 : vector<8x128xf32>
    %8 = arith.truncf %7 : vector<8x128xf32> to vector<8x128xbf16>
    %cst = arith.constant dense<0.000000e+00> : vector<8x128xf32>
    %9 = tpu.matmul %5, %2, %cst {dimension_numbers = #tpu.dot_dimension_numbers<[1], [0], [0], [1], [0, 0, 1, 1], [], []>} : vector<8x128xbf16>, vector<128x128xbf16>, vector<8x128xf32> -> vector<8x128xf32>
    %cst_7 = arith.constant dense<0.000000e+00> : vector<8x128xf32>
    %10 = tpu.matmul %8, %2, %cst_7 {dimension_numbers = #tpu.dot_dimension_numbers<[1], [0], [0], [1], [0, 0, 1, 1], [], []>} : vector<8x128xbf16>, vector<128x128xbf16>, vector<8x128xf32> -> vector<8x128xf32>
    %11 = arith.addf %9, %10 : vector<8x128xf32>
    %cst_8 = arith.constant dense<0.000000e+00> : vector<8x128xf32>
    %12 = tpu.matmul %5, %4, %cst_8 {dimension_numbers = #tpu.dot_dimension_numbers<[1], [0], [0], [1], [0, 0, 1, 1], [], []>} : vector<8x128xbf16>, vector<128x128xbf16>, vector<8x128xf32> -> vector<8x128xf32>
    %13 = arith.addf %11, %12 : vector<8x128xf32>
    %c0_9 = arith.constant 0 : index
    %c0_10 = arith.constant 0 : index
    %14 = vector.load %arg2[%c0_9, %c0_10] : memref<8x128xf32, #tpu.memory_space<vmem>>, vector<8x128xf32>
    %c1 = arith.constant 1 : index
    %c0_11 = arith.constant 0 : index
    %c0_12 = arith.constant 0 : index
    %15 = vector.load %arg3[%c1, %c0_11, %c0_12] : memref<2x128x128xbf16, #tpu.memory_space<vmem>>, vector<1x128x128xbf16>
    %16 = vector.shape_cast %15 : vector<1x128x128xbf16> to vector<128x128xbf16>
    %c1_13 = arith.constant 1 : index
    %c0_14 = arith.constant 0 : index
    %c0_15 = arith.constant 0 : index
    %17 = vector.load %arg4[%c1_13, %c0_14, %c0_15] : memref<2x128x128xbf16, #tpu.memory_space<vmem>>, vector<1x128x128xbf16>
    %18 = vector.shape_cast %17 : vector<1x128x128xbf16> to vector<128x128xbf16>
    %19 = arith.truncf %14 : vector<8x128xf32> to vector<8x128xbf16>
    %20 = arith.extf %19 : vector<8x128xbf16> to vector<8x128xf32>
    %21 = arith.subf %14, %20 : vector<8x128xf32>
    %22 = arith.truncf %21 : vector<8x128xf32> to vector<8x128xbf16>
    %cst_16 = arith.constant dense<0.000000e+00> : vector<8x128xf32>
    %23 = tpu.matmul %19, %16, %cst_16 {dimension_numbers = #tpu.dot_dimension_numbers<[1], [0], [0], [1], [0, 0, 1, 1], [], []>} : vector<8x128xbf16>, vector<128x128xbf16>, vector<8x128xf32> -> vector<8x128xf32>
    %cst_17 = arith.constant dense<0.000000e+00> : vector<8x128xf32>
    %24 = tpu.matmul %22, %16, %cst_17 {dimension_numbers = #tpu.dot_dimension_numbers<[1], [0], [0], [1], [0, 0, 1, 1], [], []>} : vector<8x128xbf16>, vector<128x128xbf16>, vector<8x128xf32> -> vector<8x128xf32>
    %25 = arith.addf %23, %24 : vector<8x128xf32>
    %cst_18 = arith.constant dense<0.000000e+00> : vector<8x128xf32>
    %26 = tpu.matmul %19, %18, %cst_18 {dimension_numbers = #tpu.dot_dimension_numbers<[1], [0], [0], [1], [0, 0, 1, 1], [], []>} : vector<8x128xbf16>, vector<128x128xbf16>, vector<8x128xf32> -> vector<8x128xf32>
    %27 = arith.addf %25, %26 : vector<8x128xf32>
    %28 = arith.addf %13, %27 : vector<8x128xf32>
    %c0_19 = arith.constant 0 : index
    %c0_20 = arith.constant 0 : index
    %29 = vector.load %arg5[%c0_19, %c0_20] : memref<1x128xf32, #tpu.memory_space<vmem>>, vector<1x128xf32>
    %30 = vector.broadcast %29 : vector<1x128xf32> to vector<8x128xf32>
    %31 = arith.addf %28, %30 : vector<8x128xf32>
    %cst_21 = arith.constant 0.000000e+00 : f32
    %32 = vector.broadcast %cst_21 : f32 to vector<8x128xf32>
    %33 = arith.cmpf oge, %31, %32 : vector<8x128xf32>
    %cst_22 = arith.constant 0.00999999977 : f32
    %34 = vector.broadcast %cst_22 : f32 to vector<8x128xf32>
    %35 = arith.mulf %34, %31 : vector<8x128xf32>
    %36 = arith.select %33, %31, %35 : vector<8x128xi1>, vector<8x128xf32>
    %c0_23 = arith.constant 0 : index
    %c0_24 = arith.constant 0 : index
    %c0_25 = arith.constant 0 : index
    %37 = vector.load %arg6[%c0_23, %c0_24, %c0_25] : memref<2x128x128xbf16, #tpu.memory_space<vmem>>, vector<1x128x128xbf16>
    %38 = vector.shape_cast %37 : vector<1x128x128xbf16> to vector<128x128xbf16>
    %c0_26 = arith.constant 0 : index
    %c0_27 = arith.constant 0 : index
    %c0_28 = arith.constant 0 : index
    %39 = vector.load %arg7[%c0_26, %c0_27, %c0_28] : memref<2x128x128xbf16, #tpu.memory_space<vmem>>, vector<1x128x128xbf16>
    %40 = vector.shape_cast %39 : vector<1x128x128xbf16> to vector<128x128xbf16>
    %41 = arith.truncf %36 : vector<8x128xf32> to vector<8x128xbf16>
    %42 = arith.extf %41 : vector<8x128xbf16> to vector<8x128xf32>
    %43 = arith.subf %36, %42 : vector<8x128xf32>
    %44 = arith.truncf %43 : vector<8x128xf32> to vector<8x128xbf16>
    %cst_29 = arith.constant dense<0.000000e+00> : vector<8x128xf32>
    %45 = tpu.matmul %41, %38, %cst_29 {dimension_numbers = #tpu.dot_dimension_numbers<[1], [0], [0], [1], [0, 0, 1, 1], [], []>} : vector<8x128xbf16>, vector<128x128xbf16>, vector<8x128xf32> -> vector<8x128xf32>
    %cst_30 = arith.constant dense<0.000000e+00> : vector<8x128xf32>
    %46 = tpu.matmul %44, %38, %cst_30 {dimension_numbers = #tpu.dot_dimension_numbers<[1], [0], [0], [1], [0, 0, 1, 1], [], []>} : vector<8x128xbf16>, vector<128x128xbf16>, vector<8x128xf32> -> vector<8x128xf32>
    %47 = arith.addf %45, %46 : vector<8x128xf32>
    %cst_31 = arith.constant dense<0.000000e+00> : vector<8x128xf32>
    %48 = tpu.matmul %41, %40, %cst_31 {dimension_numbers = #tpu.dot_dimension_numbers<[1], [0], [0], [1], [0, 0, 1, 1], [], []>} : vector<8x128xbf16>, vector<128x128xbf16>, vector<8x128xf32> -> vector<8x128xf32>
    %49 = arith.addf %47, %48 : vector<8x128xf32>
    %c0_32 = arith.constant 0 : index
    %c0_33 = arith.constant 0 : index
    %c0_34 = arith.constant 0 : index
    %50 = vector.load %arg8[%c0_32, %c0_33, %c0_34] : memref<2x1x128xf32, #tpu.memory_space<vmem>>, vector<1x1x128xf32>
    %51 = vector.shape_cast %50 : vector<1x1x128xf32> to vector<1x128xf32>
    %52 = vector.broadcast %51 : vector<1x128xf32> to vector<8x128xf32>
    %53 = arith.addf %49, %52 : vector<8x128xf32>
    %cst_35 = arith.constant 0.000000e+00 : f32
    %54 = vector.broadcast %cst_35 : f32 to vector<8x128xf32>
    %55 = arith.cmpf oge, %53, %54 : vector<8x128xf32>
    %cst_36 = arith.constant 0.00999999977 : f32
    %56 = vector.broadcast %cst_36 : f32 to vector<8x128xf32>
    %57 = arith.mulf %56, %53 : vector<8x128xf32>
    %58 = arith.select %55, %53, %57 : vector<8x128xi1>, vector<8x128xf32>
    %c1_37 = arith.constant 1 : index
    %c0_38 = arith.constant 0 : index
    %c0_39 = arith.constant 0 : index
    %59 = vector.load %arg6[%c1_37, %c0_38, %c0_39] : memref<2x128x128xbf16, #tpu.memory_space<vmem>>, vector<1x128x128xbf16>
    %60 = vector.shape_cast %59 : vector<1x128x128xbf16> to vector<128x128xbf16>
    %c1_40 = arith.constant 1 : index
    %c0_41 = arith.constant 0 : index
    %c0_42 = arith.constant 0 : index
    %61 = vector.load %arg7[%c1_40, %c0_41, %c0_42] : memref<2x128x128xbf16, #tpu.memory_space<vmem>>, vector<1x128x128xbf16>
    %62 = vector.shape_cast %61 : vector<1x128x128xbf16> to vector<128x128xbf16>
    %63 = arith.truncf %58 : vector<8x128xf32> to vector<8x128xbf16>
    %64 = arith.extf %63 : vector<8x128xbf16> to vector<8x128xf32>
    %65 = arith.subf %58, %64 : vector<8x128xf32>
    %66 = arith.truncf %65 : vector<8x128xf32> to vector<8x128xbf16>
    %cst_43 = arith.constant dense<0.000000e+00> : vector<8x128xf32>
    %67 = tpu.matmul %63, %60, %cst_43 {dimension_numbers = #tpu.dot_dimension_numbers<[1], [0], [0], [1], [0, 0, 1, 1], [], []>} : vector<8x128xbf16>, vector<128x128xbf16>, vector<8x128xf32> -> vector<8x128xf32>
    %cst_44 = arith.constant dense<0.000000e+00> : vector<8x128xf32>
    %68 = tpu.matmul %66, %60, %cst_44 {dimension_numbers = #tpu.dot_dimension_numbers<[1], [0], [0], [1], [0, 0, 1, 1], [], []>} : vector<8x128xbf16>, vector<128x128xbf16>, vector<8x128xf32> -> vector<8x128xf32>
    %69 = arith.addf %67, %68 : vector<8x128xf32>
    %cst_45 = arith.constant dense<0.000000e+00> : vector<8x128xf32>
    %70 = tpu.matmul %63, %62, %cst_45 {dimension_numbers = #tpu.dot_dimension_numbers<[1], [0], [0], [1], [0, 0, 1, 1], [], []>} : vector<8x128xbf16>, vector<128x128xbf16>, vector<8x128xf32> -> vector<8x128xf32>
    %71 = arith.addf %69, %70 : vector<8x128xf32>
    %c1_46 = arith.constant 1 : index
    %c0_47 = arith.constant 0 : index
    %c0_48 = arith.constant 0 : index
    %72 = vector.load %arg8[%c1_46, %c0_47, %c0_48] : memref<2x1x128xf32, #tpu.memory_space<vmem>>, vector<1x1x128xf32>
    %73 = vector.shape_cast %72 : vector<1x1x128xf32> to vector<1x128xf32>
    %74 = vector.broadcast %73 : vector<1x128xf32> to vector<8x128xf32>
    %75 = arith.addf %71, %74 : vector<8x128xf32>
    %cst_49 = arith.constant 0.000000e+00 : f32
    %76 = vector.broadcast %cst_49 : f32 to vector<8x128xf32>
    %77 = arith.cmpf oge, %75, %76 : vector<8x128xf32>
    %cst_50 = arith.constant 0.00999999977 : f32
    %78 = vector.broadcast %cst_50 : f32 to vector<8x128xf32>
    %79 = arith.mulf %78, %75 : vector<8x128xf32>
    %80 = arith.select %77, %75, %79 : vector<8x128xi1>, vector<8x128xf32>
    %c0_51 = arith.constant 0 : index
    %c0_52 = arith.constant 0 : index
    %81 = vector.load %arg9[%c0_51, %c0_52] : memref<128x128xbf16, #tpu.memory_space<vmem>>, vector<128x128xbf16>
    %c0_53 = arith.constant 0 : index
    %c0_54 = arith.constant 0 : index
    %82 = vector.load %arg10[%c0_53, %c0_54] : memref<128x128xbf16, #tpu.memory_space<vmem>>, vector<128x128xbf16>
    %83 = arith.truncf %80 : vector<8x128xf32> to vector<8x128xbf16>
    %84 = arith.extf %83 : vector<8x128xbf16> to vector<8x128xf32>
    %85 = arith.subf %80, %84 : vector<8x128xf32>
    %86 = arith.truncf %85 : vector<8x128xf32> to vector<8x128xbf16>
    %cst_55 = arith.constant dense<0.000000e+00> : vector<8x128xf32>
    %87 = tpu.matmul %83, %81, %cst_55 {dimension_numbers = #tpu.dot_dimension_numbers<[1], [0], [0], [1], [0, 0, 1, 1], [], []>} : vector<8x128xbf16>, vector<128x128xbf16>, vector<8x128xf32> -> vector<8x128xf32>
    %cst_56 = arith.constant dense<0.000000e+00> : vector<8x128xf32>
    %88 = tpu.matmul %86, %81, %cst_56 {dimension_numbers = #tpu.dot_dimension_numbers<[1], [0], [0], [1], [0, 0, 1, 1], [], []>} : vector<8x128xbf16>, vector<128x128xbf16>, vector<8x128xf32> -> vector<8x128xf32>
    %89 = arith.addf %87, %88 : vector<8x128xf32>
    %cst_57 = arith.constant dense<0.000000e+00> : vector<8x128xf32>
    %90 = tpu.matmul %83, %82, %cst_57 {dimension_numbers = #tpu.dot_dimension_numbers<[1], [0], [0], [1], [0, 0, 1, 1], [], []>} : vector<8x128xbf16>, vector<128x128xbf16>, vector<8x128xf32> -> vector<8x128xf32>
    %91 = arith.addf %89, %90 : vector<8x128xf32>
    %c0_58 = arith.constant 0 : index
    %c0_59 = arith.constant 0 : index
    %92 = vector.load %arg11[%c0_58, %c0_59] : memref<1x128xf32, #tpu.memory_space<vmem>>, vector<1x128xf32>
    %93 = vector.broadcast %92 : vector<1x128xf32> to vector<8x128xf32>
    %94 = arith.addf %91, %93 : vector<8x128xf32>
    %c0_60 = arith.constant 0 : index
    %c0_61 = arith.constant 0 : index
    %95 = vector.load %arg12[%c0_60, %c0_61] : memref<1x128xf32, #tpu.memory_space<vmem>>, vector<1x128xf32>
    %96 = vector.broadcast %95 : vector<1x128xf32> to vector<8x128xf32>
    %97 = arith.addf %94, %96 : vector<8x128xf32>
    %c0_62 = arith.constant 0 : index
    %c0_63 = arith.constant 0 : index
    %98 = vector.load %arg13[%c0_62, %c0_63] : memref<8x128xf32, #tpu.memory_space<vmem>>, vector<8x128xf32>
    tpu.vector_store %arg13[%c0_62, %c0_63], %97 {strides = array<i32>} : memref<8x128xf32, #tpu.memory_space<vmem>>, vector<8x128xf32>,
    return
  }
  func.func @transform_0(%arg0: i32) -> (i32, i32) {
    %c0_i32 = arith.constant 0 : i32
    %c0_i32_0 = arith.constant 0 : i32
    return %arg0, %c0_i32 : i32, i32
  }
  func.func @transform_1(%arg0: i32) -> (i32, i32) {
    %c0_i32 = arith.constant 0 : i32
    %c0_i32_0 = arith.constant 0 : i32
    return %arg0, %c0_i32 : i32, i32
  }
  func.func @transform_2(%arg0: i32) -> (i32, i32, i32) {
    %c0_i32 = arith.constant 0 : i32
    %c0_i32_0 = arith.constant 0 : i32
    %c0_i32_1 = arith.constant 0 : i32
    %c0_i32_2 = arith.constant 0 : i32
    return %c0_i32, %c0_i32_0, %c0_i32_1 : i32, i32, i32
  }
  func.func @transform_3(%arg0: i32) -> (i32, i32, i32) {
    %c0_i32 = arith.constant 0 : i32
    %c0_i32_0 = arith.constant 0 : i32
    %c0_i32_1 = arith.constant 0 : i32
    %c0_i32_2 = arith.constant 0 : i32
    return %c0_i32, %c0_i32_0, %c0_i32_1 : i32, i32, i32
  }
  func.func @transform_4(%arg0: i32) -> (i32, i32) {
    %c0_i32 = arith.constant 0 : i32
    %c0_i32_0 = arith.constant 0 : i32
    %c0_i32_1 = arith.constant 0 : i32
    return %c0_i32, %c0_i32_0 : i32, i32
  }
  func.func @transform_5(%arg0: i32) -> (i32, i32, i32) {
    %c0_i32 = arith.constant 0 : i32
    %c0_i32_0 = arith.constant 0 : i32
    %c0_i32_1 = arith.constant 0 : i32
    %c0_i32_2 = arith.constant 0 : i32
    return %c0_i32, %c0_i32_0, %c0_i32_1 : i32, i32, i32
  }
  func.func @transform_6(%arg0: i32) -> (i32, i32, i32) {
    %c0_i32 = arith.constant 0 : i32
    %c0_i32_0 = arith.constant 0 : i32
    %c0_i32_1 = arith.constant 0 : i32
    %c0_i32_2 = arith.constant 0 : i32
    return %c0_i32, %c0_i32_0, %c0_i32_1 : i32, i32, i32
  }
  func.func @transform_7(%arg0: i32) -> (i32, i32, i32) {
    %c0_i32 = arith.constant 0 : i32
    %c0_i32_0 = arith.constant 0 : i32
    %c0_i32_1 = arith.constant 0 : i32
    %c0_i32_2 = arith.constant 0 : i32
    return %c0_i32, %c0_i32_0, %c0_i32_1 : i32, i32, i32
  }
  func.func @transform_8(%arg0: i32) -> (i32, i32) {
    %c0_i32 = arith.constant 0 : i32
    %c0_i32_0 = arith.constant 0 : i32
    %c0_i32_1 = arith.constant 0 : i32
    return %c0_i32, %c0_i32_0 : i32, i32
  }
  func.func @transform_9(%arg0: i32) -> (i32, i32) {
    %c0_i32 = arith.constant 0 : i32
    %c0_i32_0 = arith.constant 0 : i32
    %c0_i32_1 = arith.constant 0 : i32
    return %c0_i32, %c0_i32_0 : i32, i32
  }
  func.func @transform_10(%arg0: i32) -> (i32, i32) {
    %c0_i32 = arith.constant 0 : i32
    %c0_i32_0 = arith.constant 0 : i32
    %c0_i32_1 = arith.constant 0 : i32
    return %c0_i32, %c0_i32_0 : i32, i32
  }
  func.func @transform_11(%arg0: i32) -> (i32, i32) {
    %c0_i32 = arith.constant 0 : i32
    %c0_i32_0 = arith.constant 0 : i32
    %c0_i32_1 = arith.constant 0 : i32
    return %c0_i32, %c0_i32_0 : i32, i32
  }
  func.func @transform_12(%arg0: i32) -> (i32, i32) {
    %c0_i32 = arith.constant 0 : i32
    %c0_i32_0 = arith.constant 0 : i32
    return %arg0, %c0_i32 : i32, i32
  }
}

module attributes {stable_mosaic.version = 11 : i64} {
  func.func @kernel(%arg0: i32, %arg1: memref<8x128xf32, #tpu.memory_space<vmem>>, %arg2: memref<8x128xf32, #tpu.memory_space<vmem>>, %arg3: memref<2x128x128xbf16, #tpu.memory_space<vmem>>, %arg4: memref<2x128x128xbf16, #tpu.memory_space<vmem>>, %arg5: memref<1x128xf32, #tpu.memory_space<vmem>>, %arg6: memref<2x128x128xbf16, #tpu.memory_space<vmem>>, %arg7: memref<2x128x128xbf16, #tpu.memory_space<vmem>>, %arg8: memref<2x1x128xf32, #tpu.memory_space<vmem>>, %arg9: memref<128x128xbf16, #tpu.memory_space<vmem>>, %arg10: memref<128x128xbf16, #tpu.memory_space<vmem>>, %arg11: memref<1x128xf32, #tpu.memory_space<vmem>>, %arg12: memref<1x128xf32, #tpu.memory_space<vmem>>, %arg13: memref<8x128xf32, #tpu.memory_space<vmem>>) attributes {dimension_semantics = [#tpu.dimension_semantics<arbitrary>], iteration_bounds = array<i64: 1>, scalar_prefetch = 0 : i64, scratch_operands = 0 : i64, tpu.core_type = #tpu.core_type<tc>, window_params = [{transform_indices = @transform_0, window_bounds = array<i64: 8, 128>}, {transform_indices = @transform_1, window_bounds = array<i64: 8, 128>}, {pipeline_mode = #tpu.pipeline_mode<synchronous>, transform_indices = @transform_2, window_bounds = array<i64: 2, 128, 128>}, {pipeline_mode = #tpu.pipeline_mode<synchronous>, transform_indices = @transform_3, window_bounds = array<i64: 2, 128, 128>}, {pipeline_mode = #tpu.pipeline_mode<synchronous>, transform_indices = @transform_4, window_bounds = array<i64: 1, 128>}, {pipeline_mode = #tpu.pipeline_mode<synchronous>, transform_indices = @transform_5, window_bounds = array<i64: 2, 128, 128>}, {pipeline_mode = #tpu.pipeline_mode<synchronous>, transform_indices = @transform_6, window_bounds = array<i64: 2, 128, 128>}, {pipeline_mode = #tpu.pipeline_mode<synchronous>, transform_indices = @transform_7, window_bounds = array<i64: 2, 1, 128>}, {pipeline_mode = #tpu.pipeline_mode<synchronous>, transform_indices = @transform_8, window_bounds = array<i64: 128, 128>}, {pipeline_mode = #tpu.pipeline_mode<synchronous>, transform_indices = @transform_9, window_bounds = array<i64: 128, 128>}, {pipeline_mode = #tpu.pipeline_mode<synchronous>, transform_indices = @transform_10, window_bounds = array<i64: 1, 128>}, {pipeline_mode = #tpu.pipeline_mode<synchronous>, transform_indices = @transform_11, window_bounds = array<i64: 1, 128>}, {transform_indices = @transform_12, window_bounds = array<i64: 8, 128>}]} {
    %c0 = arith.constant 0 : index
    %c0_0 = arith.constant 0 : index
    %0 = vector.load %arg1[%c0, %c0_0] : memref<8x128xf32, #tpu.memory_space<vmem>>, vector<8x128xf32>
    %c0_1 = arith.constant 0 : index
    %c0_2 = arith.constant 0 : index
    %c0_3 = arith.constant 0 : index
    %1 = vector.load %arg3[%c0_1, %c0_2, %c0_3] : memref<2x128x128xbf16, #tpu.memory_space<vmem>>, vector<1x128x128xbf16>
    %2 = vector.shape_cast %1 : vector<1x128x128xbf16> to vector<128x128xbf16>
    %c0_4 = arith.constant 0 : index
    %c0_5 = arith.constant 0 : index
    %c0_6 = arith.constant 0 : index
    %3 = vector.load %arg4[%c0_4, %c0_5, %c0_6] : memref<2x128x128xbf16, #tpu.memory_space<vmem>>, vector<1x128x128xbf16>
    %4 = vector.shape_cast %3 : vector<1x128x128xbf16> to vector<128x128xbf16>
    %5 = arith.truncf %0 : vector<8x128xf32> to vector<8x128xbf16>
    %6 = arith.extf %5 : vector<8x128xbf16> to vector<8x128xf32>
    %7 = arith.subf %0, %6 : vector<8x128xf32>
    %8 = arith.truncf %7 : vector<8x128xf32> to vector<8x128xbf16>
    %cst = arith.constant dense<0.000000e+00> : vector<8x128xf32>
    %9 = tpu.matmul %5, %2, %cst {dimension_numbers = #tpu.dot_dimension_numbers<[1], [0], [0], [1], [0, 0, 1, 1], [], []>} : vector<8x128xbf16>, vector<128x128xbf16>, vector<8x128xf32> -> vector<8x128xf32>
    %cst_7 = arith.constant dense<0.000000e+00> : vector<8x128xf32>
    %10 = tpu.matmul %8, %2, %cst_7 {dimension_numbers = #tpu.dot_dimension_numbers<[1], [0], [0], [1], [0, 0, 1, 1], [], []>} : vector<8x128xbf16>, vector<128x128xbf16>, vector<8x128xf32> -> vector<8x128xf32>
    %11 = arith.addf %9, %10 : vector<8x128xf32>
    %cst_8 = arith.constant dense<0.000000e+00> : vector<8x128xf32>
    %12 = tpu.matmul %5, %4, %cst_8 {dimension_numbers = #tpu.dot_dimension_numbers<[1], [0], [0], [1], [0, 0, 1, 1], [], []>} : vector<8x128xbf16>, vector<128x128xbf16>, vector<8x128xf32> -> vector<8x128xf32>
    %13 = arith.addf %11, %12 : vector<8x128xf32>
    %c0_9 = arith.constant 0 : index
    %c0_10 = arith.constant 0 : index
    %14 = vector.load %arg2[%c0_9, %c0_10] : memref<8x128xf32, #tpu.memory_space<vmem>>, vector<8x128xf32>
    %c1 = arith.constant 1 : index
    %c0_11 = arith.constant 0 : index
    %c0_12 = arith.constant 0 : index
    %15 = vector.load %arg3[%c1, %c0_11, %c0_12] : memref<2x128x128xbf16, #tpu.memory_space<vmem>>, vector<1x128x128xbf16>
    %16 = vector.shape_cast %15 : vector<1x128x128xbf16> to vector<128x128xbf16>
    %c1_13 = arith.constant 1 : index
    %c0_14 = arith.constant 0 : index
    %c0_15 = arith.constant 0 : index
    %17 = vector.load %arg4[%c1_13, %c0_14, %c0_15] : memref<2x128x128xbf16, #tpu.memory_space<vmem>>, vector<1x128x128xbf16>
    %18 = vector.shape_cast %17 : vector<1x128x128xbf16> to vector<128x128xbf16>
    %19 = arith.truncf %14 : vector<8x128xf32> to vector<8x128xbf16>
    %20 = arith.extf %19 : vector<8x128xbf16> to vector<8x128xf32>
    %21 = arith.subf %14, %20 : vector<8x128xf32>
    %22 = arith.truncf %21 : vector<8x128xf32> to vector<8x128xbf16>
    %cst_16 = arith.constant dense<0.000000e+00> : vector<8x128xf32>
    %23 = tpu.matmul %19, %16, %cst_16 {dimension_numbers = #tpu.dot_dimension_numbers<[1], [0], [0], [1], [0, 0, 1, 1], [], []>} : vector<8x128xbf16>, vector<128x128xbf16>, vector<8x128xf32> -> vector<8x128xf32>
    %cst_17 = arith.constant dense<0.000000e+00> : vector<8x128xf32>
    %24 = tpu.matmul %22, %16, %cst_17 {dimension_numbers = #tpu.dot_dimension_numbers<[1], [0], [0], [1], [0, 0, 1, 1], [], []>} : vector<8x128xbf16>, vector<128x128xbf16>, vector<8x128xf32> -> vector<8x128xf32>
    %25 = arith.addf %23, %24 : vector<8x128xf32>
    %cst_18 = arith.constant dense<0.000000e+00> : vector<8x128xf32>
    %26 = tpu.matmul %19, %18, %cst_18 {dimension_numbers = #tpu.dot_dimension_numbers<[1], [0], [0], [1], [0, 0, 1, 1], [], []>} : vector<8x128xbf16>, vector<128x128xbf16>, vector<8x128xf32> -> vector<8x128xf32>
    %27 = arith.addf %25, %26 : vector<8x128xf32>
    %28 = arith.addf %13, %27 : vector<8x128xf32>
    %c0_19 = arith.constant 0 : index
    %c0_20 = arith.constant 0 : index
    %29 = vector.load %arg5[%c0_19, %c0_20] : memref<1x128xf32, #tpu.memory_space<vmem>>, vector<1x128xf32>
    %30 = vector.broadcast %29 : vector<1x128xf32> to vector<8x128xf32>
    %31 = arith.addf %28, %30 : vector<8x128xf32>
    %cst_21 = arith.constant 0.000000e+00 : f32
    %32 = vector.broadcast %cst_21 : f32 to vector<8x128xf32>
    %33 = arith.cmpf oge, %31, %32 : vector<8x128xf32>
    %cst_22 = arith.constant 0.00999999977 : f32
    %34 = vector.broadcast %cst_22 : f32 to vector<8x128xf32>
    %35 = arith.mulf %34, %31 : vector<8x128xf32>
    %36 = arith.select %33, %31, %35 : vector<8x128xi1>, vector<8x128xf32>
    %c0_23 = arith.constant 0 : index
    %c0_24 = arith.constant 0 : index
    %c0_25 = arith.constant 0 : index
    %37 = vector.load %arg6[%c0_23, %c0_24, %c0_25] : memref<2x128x128xbf16, #tpu.memory_space<vmem>>, vector<1x128x128xbf16>
    %38 = vector.shape_cast %37 : vector<1x128x128xbf16> to vector<128x128xbf16>
    %c0_26 = arith.constant 0 : index
    %c0_27 = arith.constant 0 : index
    %c0_28 = arith.constant 0 : index
    %39 = vector.load %arg7[%c0_26, %c0_27, %c0_28] : memref<2x128x128xbf16, #tpu.memory_space<vmem>>, vector<1x128x128xbf16>
    %40 = vector.shape_cast %39 : vector<1x128x128xbf16> to vector<128x128xbf16>
    %41 = arith.truncf %36 : vector<8x128xf32> to vector<8x128xbf16>
    %42 = arith.extf %41 : vector<8x128xbf16> to vector<8x128xf32>
    %43 = arith.subf %36, %42 : vector<8x128xf32>
    %44 = arith.truncf %43 : vector<8x128xf32> to vector<8x128xbf16>
    %cst_29 = arith.constant dense<0.000000e+00> : vector<8x128xf32>
    %45 = tpu.matmul %41, %38, %cst_29 {dimension_numbers = #tpu.dot_dimension_numbers<[1], [0], [0], [1], [0, 0, 1, 1], [], []>} : vector<8x128xbf16>, vector<128x128xbf16>, vector<8x128xf32> -> vector<8x128xf32>
    %cst_30 = arith.constant dense<0.000000e+00> : vector<8x128xf32>
    %46 = tpu.matmul %44, %38, %cst_30 {dimension_numbers = #tpu.dot_dimension_numbers<[1], [0], [0], [1], [0, 0, 1, 1], [], []>} : vector<8x128xbf16>, vector<128x128xbf16>, vector<8x128xf32> -> vector<8x128xf32>
    %47 = arith.addf %45, %46 : vector<8x128xf32>
    %cst_31 = arith.constant dense<0.000000e+00> : vector<8x128xf32>
    %48 = tpu.matmul %41, %40, %cst_31 {dimension_numbers = #tpu.dot_dimension_numbers<[1], [0], [0], [1], [0, 0, 1, 1], [], []>} : vector<8x128xbf16>, vector<128x128xbf16>, vector<8x128xf32> -> vector<8x128xf32>
    %49 = arith.addf %47, %48 : vector<8x128xf32>
    %c0_32 = arith.constant 0 : index
    %c0_33 = arith.constant 0 : index
    %c0_34 = arith.constant 0 : index
    %50 = vector.load %arg8[%c0_32, %c0_33, %c0_34] : memref<2x1x128xf32, #tpu.memory_space<vmem>>, vector<1x1x128xf32>
    %51 = vector.shape_cast %50 : vector<1x1x128xf32> to vector<1x128xf32>
    %52 = vector.broadcast %51 : vector<1x128xf32> to vector<8x128xf32>
    %53 = arith.addf %49, %52 : vector<8x128xf32>
    %cst_35 = arith.constant 0.000000e+00 : f32
    %54 = vector.broadcast %cst_35 : f32 to vector<8x128xf32>
    %55 = arith.cmpf oge, %53, %54 : vector<8x128xf32>
    %cst_36 = arith.constant 0.00999999977 : f32
    %56 = vector.broadcast %cst_36 : f32 to vector<8x128xf32>
    %57 = arith.mulf %56, %53 : vector<8x128xf32>
    %58 = arith.select %55, %53, %57 : vector<8x128xi1>, vector<8x128xf32>
    %c1_37 = arith.constant 1 : index
    %c0_38 = arith.constant 0 : index
    %c0_39 = arith.constant 0 : index
    %59 = vector.load %arg6[%c1_37, %c0_38, %c0_39] : memref<2x128x128xbf16, #tpu.memory_space<vmem>>, vector<1x128x128xbf16>
    %60 = vector.shape_cast %59 : vector<1x128x128xbf16> to vector<128x128xbf16>
    %c1_40 = arith.constant 1 : index
    %c0_41 = arith.constant 0 : index
    %c0_42 = arith.constant 0 : index
    %61 = vector.load %arg7[%c1_40, %c0_41, %c0_42] : memref<2x128x128xbf16, #tpu.memory_space<vmem>>, vector<1x128x128xbf16>
    %62 = vector.shape_cast %61 : vector<1x128x128xbf16> to vector<128x128xbf16>
    %63 = arith.truncf %58 : vector<8x128xf32> to vector<8x128xbf16>
    %64 = arith.extf %63 : vector<8x128xbf16> to vector<8x128xf32>
    %65 = arith.subf %58, %64 : vector<8x128xf32>
    %66 = arith.truncf %65 : vector<8x128xf32> to vector<8x128xbf16>
    %cst_43 = arith.constant dense<0.000000e+00> : vector<8x128xf32>
    %67 = tpu.matmul %63, %60, %cst_43 {dimension_numbers = #tpu.dot_dimension_numbers<[1], [0], [0], [1], [0, 0, 1, 1], [], []>} : vector<8x128xbf16>, vector<128x128xbf16>, vector<8x128xf32> -> vector<8x128xf32>
    %cst_44 = arith.constant dense<0.000000e+00> : vector<8x128xf32>
    %68 = tpu.matmul %66, %60, %cst_44 {dimension_numbers = #tpu.dot_dimension_numbers<[1], [0], [0], [1], [0, 0, 1, 1], [], []>} : vector<8x128xbf16>, vector<128x128xbf16>, vector<8x128xf32> -> vector<8x128xf32>
    %69 = arith.addf %67, %68 : vector<8x128xf32>
    %cst_45 = arith.constant dense<0.000000e+00> : vector<8x128xf32>
    %70 = tpu.matmul %63, %62, %cst_45 {dimension_numbers = #tpu.dot_dimension_numbers<[1], [0], [0], [1], [0, 0, 1, 1], [], []>} : vector<8x128xbf16>, vector<128x128xbf16>, vector<8x128xf32> -> vector<8x128xf32>
    %71 = arith.addf %69, %70 : vector<8x128xf32>
    %c1_46 = arith.constant 1 : index
    %c0_47 = arith.constant 0 : index
    %c0_48 = arith.constant 0 : index
    %72 = vector.load %arg8[%c1_46, %c0_47, %c0_48] : memref<2x1x128xf32, #tpu.memory_space<vmem>>, vector<1x1x128xf32>
    %73 = vector.shape_cast %72 : vector<1x1x128xf32> to vector<1x128xf32>
    %74 = vector.broadcast %73 : vector<1x128xf32> to vector<8x128xf32>
    %75 = arith.addf %71, %74 : vector<8x128xf32>
    %cst_49 = arith.constant 0.000000e+00 : f32
    %76 = vector.broadcast %cst_49 : f32 to vector<8x128xf32>
    %77 = arith.cmpf oge, %75, %76 : vector<8x128xf32>
    %cst_50 = arith.constant 0.00999999977 : f32
    %78 = vector.broadcast %cst_50 : f32 to vector<8x128xf32>
    %79 = arith.mulf %78, %75 : vector<8x128xf32>
    %80 = arith.select %77, %75, %79 : vector<8x128xi1>, vector<8x128xf32>
    %c0_51 = arith.constant 0 : index
    %c0_52 = arith.constant 0 : index
    %81 = vector.load %arg9[%c0_51, %c0_52] : memref<128x128xbf16, #tpu.memory_space<vmem>>, vector<128x128xbf16>
    %c0_53 = arith.constant 0 : index
    %c0_54 = arith.constant 0 : index
    %82 = vector.load %arg10[%c0_53, %c0_54] : memref<128x128xbf16, #tpu.memory_space<vmem>>, vector<128x128xbf16>
    %83 = arith.truncf %80 : vector<8x128xf32> to vector<8x128xbf16>
    %84 = arith.extf %83 : vector<8x128xbf16> to vector<8x128xf32>
    %85 = arith.subf %80, %84 : vector<8x128xf32>
    %86 = arith.truncf %85 : vector<8x128xf32> to vector<8x128xbf16>
    %cst_55 = arith.constant dense<0.000000e+00> : vector<8x128xf32>
    %87 = tpu.matmul %83, %81, %cst_55 {dimension_numbers = #tpu.dot_dimension_numbers<[1], [0], [0], [1], [0, 0, 1, 1], [], []>} : vector<8x128xbf16>, vector<128x128xbf16>, vector<8x128xf32> -> vector<8x128xf32>
    %cst_56 = arith.constant dense<0.000000e+00> : vector<8x128xf32>
    %88 = tpu.matmul %86, %81, %cst_56 {dimension_numbers = #tpu.dot_dimension_numbers<[1], [0], [0], [1], [0, 0, 1, 1], [], []>} : vector<8x128xbf16>, vector<128x128xbf16>, vector<8x128xf32> -> vector<8x128xf32>
    %89 = arith.addf %87, %88 : vector<8x128xf32>
    %cst_57 = arith.constant dense<0.000000e+00> : vector<8x128xf32>
    %90 = tpu.matmul %83, %82, %cst_57 {dimension_numbers = #tpu.dot_dimension_numbers<[1], [0], [0], [1], [0, 0, 1, 1], [], []>} : vector<8x128xbf16>, vector<128x128xbf16>, vector<8x128xf32> -> vector<8x128xf32>
    %91 = arith.addf %89, %90 : vector<8x128xf32>
    %c0_58 = arith.constant 0 : index
    %c0_59 = arith.constant 0 : index
    %92 = vector.load %arg11[%c0_58, %c0_59] : memref<1x128xf32, #tpu.memory_space<vmem>>, vector<1x128xf32>
    %93 = vector.broadcast %92 : vector<1x128xf32> to vector<8x128xf32>
    %94 = arith.addf %91, %93 : vector<8x128xf32>
    %c0_60 = arith.constant 0 : index
    %c0_61 = arith.constant 0 : index
    %95 = vector.load %arg12[%c0_60, %c0_61] : memref<1x128xf32, #tpu.memory_space<vmem>>, vector<1x128xf32>
    %96 = vector.broadcast %95 : vector<1x128xf32> to vector<8x128xf32>
    %97 = arith.addf %94, %96 : vector<8x128xf32>
    %c0_62 = arith.constant 0 : index
    %c0_63 = arith.constant 0 : index
    %98 = vector.load %arg13[%c0_62, %c0_63] : memref<8x128xf32, #tpu.memory_space<vmem>>, vector<8x128xf32>
    tpu.vector_store %arg13[%c0_62, %c0_63], %97 {strides = array<i32>} : memref<8x128xf32, #tpu.memory_space<vmem>>, vector<8x128xf32>,
    return
  }
  func.func @transform_0(%arg0: i32) -> (i32, i32) {
    %c0_i32 = arith.constant 0 : i32
    %c0_i32_0 = arith.constant 0 : i32
    return %arg0, %c0_i32 : i32, i32
  }
  func.func @transform_1(%arg0: i32) -> (i32, i32) {
    %c0_i32 = arith.constant 0 : i32
    %c0_i32_0 = arith.constant 0 : i32
    return %arg0, %c0_i32 : i32, i32
  }
  func.func @transform_2(%arg0: i32) -> (i32, i32, i32) {
    %c0_i32 = arith.constant 0 : i32
    %c0_i32_0 = arith.constant 0 : i32
    %c0_i32_1 = arith.constant 0 : i32
    %c0_i32_2 = arith.constant 0 : i32
    return %c0_i32, %c0_i32_0, %c0_i32_1 : i32, i32, i32
  }
  func.func @transform_3(%arg0: i32) -> (i32, i32, i32) {
    %c0_i32 = arith.constant 0 : i32
    %c0_i32_0 = arith.constant 0 : i32
    %c0_i32_1 = arith.constant 0 : i32
    %c0_i32_2 = arith.constant 0 : i32
    return %c0_i32, %c0_i32_0, %c0_i32_1 : i32, i32, i32
  }
  func.func @transform_4(%arg0: i32) -> (i32, i32) {
    %c0_i32 = arith.constant 0 : i32
    %c0_i32_0 = arith.constant 0 : i32
    %c0_i32_1 = arith.constant 0 : i32
    return %c0_i32, %c0_i32_0 : i32, i32
  }
  func.func @transform_5(%arg0: i32) -> (i32, i32, i32) {
    %c0_i32 = arith.constant 0 : i32
    %c0_i32_0 = arith.constant 0 : i32
    %c0_i32_1 = arith.constant 0 : i32
    %c0_i32_2 = arith.constant 0 : i32
    return %c0_i32, %c0_i32_0, %c0_i32_1 : i32, i32, i32
  }
  func.func @transform_6(%arg0: i32) -> (i32, i32, i32) {
    %c0_i32 = arith.constant 0 : i32
    %c0_i32_0 = arith.constant 0 : i32
    %c0_i32_1 = arith.constant 0 : i32
    %c0_i32_2 = arith.constant 0 : i32
    return %c0_i32, %c0_i32_0, %c0_i32_1 : i32, i32, i32
  }
  func.func @transform_7(%arg0: i32) -> (i32, i32, i32) {
    %c0_i32 = arith.constant 0 : i32
    %c0_i32_0 = arith.constant 0 : i32
    %c0_i32_1 = arith.constant 0 : i32
    %c0_i32_2 = arith.constant 0 : i32
    return %c0_i32, %c0_i32_0, %c0_i32_1 : i32, i32, i32
  }
  func.func @transform_8(%arg0: i32) -> (i32, i32) {
    %c0_i32 = arith.constant 0 : i32
    %c0_i32_0 = arith.constant 0 : i32
    %c0_i32_1 = arith.constant 0 : i32
    return %c0_i32, %c0_i32_0 : i32, i32
  }
  func.func @transform_9(%arg0: i32) -> (i32, i32) {
    %c0_i32 = arith.constant 0 : i32
    %c0_i32_0 = arith.constant 0 : i32
    %c0_i32_1 = arith.constant 0 : i32
    return %c0_i32, %c0_i32_0 : i32, i32
  }
  func.func @transform_10(%arg0: i32) -> (i32, i32) {
    %c0_i32 = arith.constant 0 : i32
    %c0_i32_0 = arith.constant 0 : i32
    %c0_i32_1 = arith.constant 0 : i32
    return %c0_i32, %c0_i32_0 : i32, i32
  }
  func.func @transform_11(%arg0: i32) -> (i32, i32) {
    %c0_i32 = arith.constant 0 : i32
    %c0_i32_0 = arith.constant 0 : i32
    %c0_i32_1 = arith.constant 0 : i32
    return %c0_i32, %c0_i32_0 : i32, i32
  }
  func.func @transform_12(%arg0: i32) -> (i32, i32) {
    %c0_i32 = arith.constant 0 : i32
    %c0_i32_0 = arith.constant 0 : i32
    return %arg0, %c0_i32 : i32, i32
  }
}

</mosaic_0001>

<bundles_post_ra>
// kernel: tpu_custom_call.1
= control target key start
LH: loop header
LB: loop body
LE: loop exit
PB: predicated region body
PF: predicated region fallthrough
CT: control target
= control target key end

     0   :  { %17 = vsyncpa [#allocation3], 0  ;;  %s2697_s0 = inlined_call_operand.hbm [shape: f32[8,128], index: 0, kind: input, shape index: {}]   ;;  %s2698_s1 = inlined_call_operand.hbm [shape: f32[8,128], index: 1, kind: input, shape index: {}]   ;;  %s2699_s2 = inlined_call_operand.hbm [shape: bf16[2,128,128], index: 2, kind: input, shape index: {}]   ;;  %s2700_s3 = inlined_call_operand.hbm [shape: bf16[2,128,128], index: 3, kind: input, shape index: {}]   ;;  %s2701_s4 = inlined_call_operand.vmem [shape: f32[1,128], index: 4, kind: input, shape index: {}]   ;;  %s2702_s5 = inlined_call_operand.hbm [shape: bf16[2,128,128], index: 5, kind: input, shape index: {}]   ;;  %s2703_s6 = inlined_call_operand.hbm [shape: bf16[2,128,128], index: 6, kind: input, shape index: {}]   ;;  %s2704_s7 = inlined_call_operand.vmem [shape: f32[2,1,128], index: 7, kind: input, shape index: {}]   ;;  %s2705_s8 = inlined_call_operand.hbm [shape: bf16[128,128], index: 8, kind: input, shape index: {}]   ;;  %s2706_s9 = inlined_call_operand.hbm [shape: bf16[128,128], index: 9, kind: input, shape index: {}]   ;;  %s2707_s10 = inlined_call_operand.vmem [shape: f32[1,128], index: 10, kind: input, shape index: {}]   ;;  %s2708_s11 = inlined_call_operand.vmem [shape: f32[1,128], index: 11, kind: input, shape index: {}]   ;;  %s2709_s12 = inlined_call_operand.hbm [shape: f32[8,128], index: 12, kind: output, shape index: {}]  }
   0x1   :  { %18 = vsyncpa [#allocation6], 0 }
   0x2   :  { %19 = vsyncpa [#allocation9], 0 }
   0x3   :  { %20 = vsyncpa [#allocation12], 0 }
   0x4   :  { %21 = vsyncpa [#allocation15], 0 }
   0x5   :  { %22 = vsyncpa [#allocation4], 0  ;;  %s2314_s21 = smov [#allocation5]   ;;  %s2104_s25 = scalar_lea.hbm %s2698_s1, 128 }
   0x6   :  { %s39_s22 = sshll.u32 %s2314_s21, 4  ;;  %p2105_p0 = scmp.ne.s32.totalorder %s2698_s1, %s2104_s25  ;;  %s40_s22 = int_to_ptr.vmem [resolvable:$true] %s39_s22 }
   0x7   :  { %p2108_p1 = scmp.lt.u32.totalorder %s2104_s25, %s2698_s1 }
   0x9   :  { %p2110_p2 = pnand %p2108_p1, %p2105_p0 }
   0xb   :  { %2113 = shalt.err (!%p2110_p2)
}
   0xc   :  { %s2114_s30 = scalar_lea.vmem %s40_s22, 128  ;;  %p2119_p4 = scmp.lt.s32.totalorder %s40_s22, %s40_s22 }
   0xd   :  { %p2115_p3 = scmp.ne.s32.totalorder %s40_s22, %s2114_s30  ;;  %p2120_p5 = scmp.lt.s32.totalorder %s2114_s30, %s2114_s30 }
   0xf   :  { %p2121_p6 = por %p2120_p5, %p2119_p4 }
  0x11   :  { %p2122_p7 = pnand %p2121_p6, %p2115_p3 }
  0x13   :  { %2125 = shalt.err (!%p2122_p7)
}
  0x14   :  { %42 = dma.hbm_to_vmem [thread:$0]  %s2698_s1, 128, %s40_s22, [#allocation6]  }
  0x15   :  { %s2315_s15 = smov [#allocation8]   ;;  %s2316_s17 = smov [#allocation11]  }
  0x16   :  { %s60_s16 = sshll.u32 %s2315_s15, 4  ;;  %s86_s18 = sshll.u32 %s2316_s17, 4  ;;  %s61_s16 = int_to_ptr.vmem [resolvable:$true] %s60_s16  ;;  %s87_s18 = int_to_ptr.vmem [resolvable:$true] %s86_s18 }
  0x17   :  { %s2126_s21 = scalar_lea.hbm %s2700_s3, 2048 }
  0x18   :  { %p2127_p8 = scmp.ne.s32.totalorder %s2700_s3, %s2126_s21  ;;  %p2130_p9 = scmp.lt.u32.totalorder %s2126_s21, %s2700_s3 }
  0x1a   :  { %p2132_p10 = pnand %p2130_p9, %p2127_p8 }
  0x1c   :  { %2135 = shalt.err (!%p2132_p10)
}
  0x1d   :  { %s2136_s1 = scalar_lea.vmem %s61_s16, 2048  ;;  %p2141_p12 = scmp.lt.s32.totalorder %s61_s16, %s61_s16 }
  0x1e   :  { %p2137_p11 = scmp.ne.s32.totalorder %s61_s16, %s2136_s1  ;;  %p2142_p13 = scmp.lt.s32.totalorder %s2136_s1, %s2136_s1 }
  0x20   :  { %p2143_p0 = por %p2142_p13, %p2141_p12 }
  0x22   :  { %p2144_p1 = pnand %p2143_p0, %p2137_p11 }
  0x24   :  { %2147 = shalt.err (!%p2144_p1)
}
  0x25   :  { %s2317_s22 = smov 64   ;;  %s2318_s27 = smov 4  }
  0x26   :  { %66 = dma.hbm_to_vmem [thread:$0]  %s2700_s3, 2048, %s61_s16, [#allocation9], %s2317_s22, %s2317_s22, %s2318_s27  }
  0x27   :  { %s2148_s14 = scalar_lea.hbm %s2703_s6, 2048 }
  0x28   :  { %p2149_p2 = scmp.ne.s32.totalorder %s2703_s6, %s2148_s14  ;;  %p2152_p3 = scmp.lt.u32.totalorder %s2148_s14, %s2703_s6 }
  0x2a   :  { %p2154_p4 = pnand %p2152_p3, %p2149_p2 }
  0x2c   :  { %2157 = shalt.err (!%p2154_p4)
}
  0x2d   :  { %s2158_s21 = scalar_lea.vmem %s87_s18, 2048  ;;  %p2163_p6 = scmp.lt.s32.totalorder %s87_s18, %s87_s18 }
  0x2e   :  { %p2159_p5 = scmp.ne.s32.totalorder %s87_s18, %s2158_s21  ;;  %p2164_p7 = scmp.lt.s32.totalorder %s2158_s21, %s2158_s21 }
  0x30   :  { %p2165_p8 = por %p2164_p7, %p2163_p6 }
  0x32   :  { %p2166_p9 = pnand %p2165_p8, %p2159_p5 }
  0x34   :  { %2169 = shalt.err (!%p2166_p9)
}
  0x35   :  { %92 = dma.hbm_to_vmem [thread:$0]  %s2703_s6, 2048, %s87_s18, [#allocation12], %s2317_s22, %s2317_s22, %s2318_s27  }
  0x36   :  { %s2319_s23 = smov [#allocation2]   ;;  %s2320_s25 = smov [#allocation7]  }
  0x37   :  { %s29_s24 = sshll.u32 %s2319_s23, 4  ;;  %s48_s26 = sshll.u32 %s2320_s25, 4  ;;  %s30_s24 = int_to_ptr.vmem [resolvable:$true] %s29_s24  ;;  %s49_s26 = int_to_ptr.vmem [resolvable:$true] %s48_s26 }
  0x38   :  { %s2170_s29 = scalar_lea.hbm %s2697_s0, 128 }
  0x39   :  { %p2171_p10 = scmp.ne.s32.totalorder %s2697_s0, %s2170_s29  ;;  %p2174_p11 = scmp.lt.u32.totalorder %s2170_s29, %s2697_s0 }
  0x3b   :  { %p2176_p12 = pnand %p2174_p11, %p2171_p10 }
  0x3d   :  { %2179 = shalt.err (!%p2176_p12)
}
  0x3e   :  { %s2180_s6 = scalar_lea.vmem %s30_s24, 128  ;;  %p2185_p0 = scmp.lt.s32.totalorder %s30_s24, %s30_s24 }
  0x3f   :  { %p2181_p13 = scmp.ne.s32.totalorder %s30_s24, %s2180_s6  ;;  %p2186_p1 = scmp.lt.s32.totalorder %s2180_s6, %s2180_s6 }
  0x41   :  { %p2187_p2 = por %p2186_p1, %p2185_p0 }
  0x43   :  { %p2188_p3 = pnand %p2187_p2, %p2181_p13 }
  0x45   :  { %2191 = shalt.err (!%p2188_p3)
}
  0x46   :  { %32 = dma.hbm_to_vmem [thread:$0]  %s2697_s0, 128, %s30_s24, [#allocation3]  }
  0x47   :  { %s2192_s21 = scalar_lea.hbm %s2699_s2, 2048 }
  0x48   :  { %p2193_p4 = scmp.ne.s32.totalorder %s2699_s2, %s2192_s21  ;;  %p2196_p5 = scmp.lt.u32.totalorder %s2192_s21, %s2699_s2 }
  0x4a   :  { %p2198_p6 = pnand %p2196_p5, %p2193_p4 }
  0x4c   :  { %2201 = shalt.err (!%p2198_p6)
}
  0x4d   :  { %s2202_s1 = scalar_lea.vmem %s49_s26, 2048  ;;  %p2207_p8 = scmp.lt.s32.totalorder %s49_s26, %s49_s26 }
  0x4e   :  { %p2203_p7 = scmp.ne.s32.totalorder %s49_s26, %s2202_s1  ;;  %p2208_p9 = scmp.lt.s32.totalorder %s2202_s1, %s2202_s1 }
  0x50   :  { %p2209_p10 = por %p2208_p9, %p2207_p8 }
  0x52   :  { %p2210_p11 = pnand %p2209_p10, %p2203_p7 }
  0x54   :  { %2213 = shalt.err (!%p2210_p11)
}
  0x55   :  { %54 = dma.hbm_to_vmem [thread:$0]  %s2699_s2, 2048, %s49_s26, [#allocation6], %s2317_s22, %s2317_s22, %s2318_s27  }
  0x56   :  { %s2321_s28 = smov [#allocation10]   ;;  %s2322_s30 = smov [#allocation13]  }
  0x57   :  { %s74_s29 = sshll.u32 %s2321_s28, 4  ;;  %s100_s13 = sshll.u32 %s2322_s30, 4  ;;  %s75_s29 = int_to_ptr.vmem [resolvable:$true] %s74_s29  ;;  %s101_s13 = int_to_ptr.vmem [resolvable:$true] %s100_s13 }
  0x58   :  { %s2214_s6 = scalar_lea.hbm %s2702_s5, 2048 }
  0x59   :  { %p2215_p12 = scmp.ne.s32.totalorder %s2702_s5, %s2214_s6  ;;  %p2218_p13 = scmp.lt.u32.totalorder %s2214_s6, %s2702_s5 }
  0x5b   :  { %p2220_p0 = pnand %p2218_p13, %p2215_p12 }
  0x5d   :  { %2223 = shalt.err (!%p2220_p0)
}
  0x5e   :  { %s2224_s2 = scalar_lea.vmem %s75_s29, 2048  ;;  %p2229_p2 = scmp.lt.s32.totalorder %s75_s29, %s75_s29 }
  0x5f   :  { %p2225_p1 = scmp.ne.s32.totalorder %s75_s29, %s2224_s2  ;;  %p2230_p3 = scmp.lt.s32.totalorder %s2224_s2, %s2224_s2 }
  0x61   :  { %p2231_p4 = por %p2230_p3, %p2229_p2 }
  0x63   :  { %p2232_p5 = pnand %p2231_p4, %p2225_p1 }
  0x65   :  { %2235 = shalt.err (!%p2232_p5)
}
  0x66   :  { %80 = dma.hbm_to_vmem [thread:$0]  %s2702_s5, 2048, %s75_s29, [#allocation9], %s2317_s22, %s2317_s22, %s2318_s27  }
  0x67   :  { %s2236_s23 = scalar_lea.hbm %s2705_s8, 1024 }
  0x68   :  { %p2237_p6 = scmp.ne.s32.totalorder %s2705_s8, %s2236_s23  ;;  %p2240_p7 = scmp.lt.u32.totalorder %s2236_s23, %s2705_s8 }
  0x6a   :  { %p2242_p8 = pnand %p2240_p7, %p2237_p6 }
  0x6c   :  { %2245 = shalt.err (!%p2242_p8)
}
  0x6d   :  { %s2246_s28 = scalar_lea.vmem %s101_s13, 1024  ;;  %p2251_p10 = scmp.lt.s32.totalorder %s101_s13, %s101_s13 }
  0x6e   :  { %p2247_p9 = scmp.ne.s32.totalorder %s101_s13, %s2246_s28  ;;  %p2252_p11 = scmp.lt.s32.totalorder %s2246_s28, %s2246_s28 }
  0x70   :  { %p2253_p12 = por %p2252_p11, %p2251_p10 }
  0x72   :  { %p2254_p13 = pnand %p2253_p12, %p2247_p9 }
  0x74   :  { %2257 = shalt.err (!%p2254_p13)
}
  0x75   :  { %106 = dma.hbm_to_vmem [thread:$0]  %s2705_s8, 1024, %s101_s13, [#allocation12], %s2317_s22, %s2317_s22, %s2318_s27  }
  0x76   :  { %s2323_s30 = smov [#allocation14]   ;;  %s2258_s18 = scalar_lea.hbm %s2706_s9, 1024 }
  0x77   :  { %s112_s14 = sshll.u32 %s2323_s30, 4  ;;  %p2259_p0 = scmp.ne.s32.totalorder %s2706_s9, %s2258_s18  ;;  %s113_s14 = int_to_ptr.vmem [resolvable:$true] %s112_s14 }
  0x78   :  { %p2262_p1 = scmp.lt.u32.totalorder %s2258_s18, %s2706_s9 }
  0x7a   :  { %p2264_p2 = pnand %p2262_p1, %p2259_p0 }
  0x7c   :  { %2267 = shalt.err (!%p2264_p2)
}
  0x7d   :  { %s2268_s26 = scalar_lea.vmem %s113_s14, 1024  ;;  %p2273_p4 = scmp.lt.s32.totalorder %s113_s14, %s113_s14 }
  0x7e   :  { %p2269_p3 = scmp.ne.s32.totalorder %s113_s14, %s2268_s26  ;;  %p2274_p5 = scmp.lt.s32.totalorder %s2268_s26, %s2268_s26 }
  0x80   :  { %p2275_p6 = por %p2274_p5, %p2273_p4 }
  0x82   :  { %p2276_p7 = pnand %p2275_p6, %p2269_p3 }
  0x84   :  { %2279 = shalt.err (!%p2276_p7)
}
  0x85   :  { %118 = dma.hbm_to_vmem [thread:$0]  %s2706_s9, 1024, %s113_s14, [#allocation15], %s2317_s22, %s2317_s22, %s2318_s27  }
  0x86   :  { %2302 = dma.done.wait [#allocation3], 128  }
  0x87   :  { %2303 = vsyncadd [#allocation3], 4294967168 }
  0x88   :  { %2304 = dma.done.wait [#allocation6], 2176  }
  0x89   :  { %2305 = vsyncadd [#allocation6], 4294965120 }
  0x8a   :  { %2306 = dma.done.wait [#allocation9], 4096  }
  0x8b   :  { %2307 = vsyncadd [#allocation9], 4294963200 }
  0x8c   :  { %2308 = dma.done.wait [#allocation12], 3072  }
  0x8d   :  { %2309 = vsyncadd [#allocation12], 4294964224 }
  0x8e   :  { %2310 = dma.done.wait [#allocation15], 1024  }
  0x8f   :  { %2311 = vsyncadd [#allocation15], 4294966272  ;;  %v2324_v0 = vmov 0.0   ;;  %vm2325_vm0 = vmmov 0   ;;  %v2024_v1 = vld [vmem:[#allocation7] sm:$0xff]   ;;  %v2025_v2 = vld [vmem:[#allocation7 + $0x8] sm:$0xff]  }
  0x90   :  { %1711 = vmatprep.subr.bf16.mxu0 %v2324_v0  ;;  %1731 = vmatprep.subr.bf16.mxu1 %v2324_v0  ;;  %v2026_v3 = vld [vmem:[#allocation7 + $0x10] sm:$0xff]   ;;  %v2027_v4 = vld [vmem:[#allocation7 + $0x18] sm:$0xff]   ;;  %v2028_v5 = vld [vmem:[#allocation7 + $0x20] sm:$0xff]   ;;  %s2326_s1 = smov [#allocation16]  }
  0x91   :  { %1727 = vmatprep.mubr.msk.bf16.mxu0 %vm2325_vm0, %v2324_v0  ;;  %1747 = vmatprep.mubr.msk.bf16.mxu1 %vm2325_vm0, %v2324_v0  ;;  %v148_v6 = vld [vmem:[#allocation2] sm:$0xff]  ;;  %v2029_v8 = vld [vmem:[#allocation7 + $0x28] sm:$0xff]   ;;  %v2031_v12 = vld [vmem:[#allocation7 + $0x38] sm:$0xff]   ;;  %s1477_s0 = sshll.u32 %s2326_s1, 4  ;;  %s1478_s0 = int_to_ptr.vmem [resolvable:$true] %s1477_s0 }
  0x92   :  { %1712 = vmatpush3.bf16.msra.mxu0 %v2024_v1  ;;  %1732 = vmatpush3.bf16.msra.mxu1 %v2024_v1  ;;  %v2520_v7 = vpack.c.bf16 %v148_v6, %v148_v6  ;;  %v2030_v10 = vld [vmem:[#allocation7 + $0x30] sm:$0xff]   ;;  %v2032_v14 = vld [vmem:[#allocation8] sm:$0xff]   ;;  %v2034_v16 = vld [vmem:[#allocation8 + $0x8] sm:$0xff]   ;;  %s2280_s24 = scalar_lea.vmem %s1478_s0, 128  ;;  %p2285_p9 = scmp.lt.s32.totalorder %s1478_s0, %s1478_s0 }
  0x93   :  { %1713 = vmatprep.subr.bf16.mxu0 %v2324_v0  ;;  %1733 = vmatprep.subr.bf16.mxu1 %v2324_v0  ;;  %v2033_v15 = vld [vmem:[#allocation7 + $0x40] sm:$0xff]   ;;  %v2531_v17 = vld [vmem:[#allocation7 + $0x48] sm:$0xff]   ;;  %v2036_v18 = vld [vmem:[#allocation8 + $0x10] sm:$0xff]   ;;  %p2281_p8 = scmp.ne.s32.totalorder %s1478_s0, %s2280_s24  ;;  %p2286_p10 = scmp.lt.s32.totalorder %s2280_s24, %s2280_s24 }
  0x94   :  { %v182_v9 = vunpack.c.l.bf16 %v2520_v7  ;;  %v2037_v19 = vld [vmem:[#allocation7 + $0x50] sm:$0xff]   ;;  %v2038_v20 = vld [vmem:[#allocation8 + $0x18] sm:$0xff]   ;;  %v2040_v22 = vld [vmem:[#allocation8 + $0x20] sm:$0xff]  }
  0x95   :  { %v2039_v21 = vld [vmem:[#allocation7 + $0x58] sm:$0xff]   ;;  %v2041_v23 = vld [vmem:[#allocation7 + $0x60] sm:$0xff]   ;;  %v2042_v25 = vld [vmem:[#allocation8 + $0x28] sm:$0xff]   ;;  %p2287_p11 = por %p2286_p10, %p2285_p9 }
  0x96   :  { %1714 = vmatpush3.bf16.msra.mxu0 %v2025_v2  ;;  %1734 = vmatpush3.bf16.msra.mxu1 %v2025_v2  ;;  %v183_v11 = vsub.f32 %v148_v6, %v182_v9  ;;  %v402_v24 = vld [vmem:[#allocation5] sm:$0xff]  ;;  %v2043_v26 = vld [vmem:[#allocation7 + $0x68] sm:$0xff]   ;;  %v2044_v28 = vld [vmem:[#allocation8 + $0x30] sm:$0xff]  }
  0x97   :  { %1715 = vmatprep.subr.bf16.mxu0 %v2324_v0  ;;  %1735 = vmatprep.subr.bf16.mxu1 %v2324_v0  ;;  %v2547_v27 = vpack.c.bf16 %v402_v24, %v402_v24  ;;  %v2045_v29 = vld [vmem:[#allocation7 + $0x70] sm:$0xff]   ;;  %v2046_v31 = vld [vmem:[#allocation8 + $0x38] sm:$0xff]   ;;  %v2048_v34 = vld [vmem:[#allocation8 + $0x40] sm:$0xff]   ;;  %p2288_p12 = pnand %p2287_p11, %p2281_p8 }
  0x98   :  { %v184_v13 = vpack.c.bf16 %v183_v11, %v183_v11  ;;  %v2047_v32 = vld [vmem:[#allocation7 + $0x78] sm:$0xff]   ;;  %v2049_v36 = vld [vmem:[#allocation8 + $0x48] sm:$0xff]   ;;  %v2050_v37 = vld [vmem:[#allocation8 + $0x50] sm:$0xff]  }
  0x99   :  { %v438_v30 = vunpack.c.l.bf16 %v2547_v27  ;;  %v2051_v38 = vld [vmem:[#allocation8 + $0x58] sm:$0xff]   ;;  %v2052_v39 = vld [vmem:[#allocation8 + $0x60] sm:$0xff]   ;;  %v2053_v40 = vld [vmem:[#allocation8 + $0x68] sm:$0xff]  }
  0x9a   :  { %1716 = vmatpush3.bf16.msra.mxu0 %v2026_v3  ;;  %1736 = vmatpush3.bf16.msra.mxu1 %v2026_v3  ;;  %v2054_v41 = vld [vmem:[#allocation8 + $0x70] sm:$0xff]   ;;  %v2055_v42 = vld [vmem:[#allocation8 + $0x78] sm:$0xff]   ;;  %v2056_v43 = vld [vmem:[#allocation10] sm:$0xff]  }
  0x9b   :  { %1717 = vmatprep.subr.bf16.mxu0 %v2324_v0  ;;  %1737 = vmatprep.subr.bf16.mxu1 %v2324_v0  ;;  %v439_v33 = vsub.f32 %v402_v24, %v438_v30  ;;  %v2057_v44 = vld [vmem:[#allocation10 + $0x8] sm:$0xff]   ;;  %v2058_v45 = vld [vmem:[#allocation10 + $0x10] sm:$0xff]   ;;  %v2059_v46 = vld [vmem:[#allocation10 + $0x18] sm:$0xff]  }
  0x9c   :  { %v2060_v47 = vld [vmem:[#allocation10 + $0x20] sm:$0xff]   ;;  %v2061_v48 = vld [vmem:[#allocation10 + $0x28] sm:$0xff]   ;;  %v2062_v49 = vld [vmem:[#allocation10 + $0x30] sm:$0xff]  }
  0x9d   :  { %v440_v35 = vpack.c.bf16 %v439_v33, %v439_v33  ;;  %v2063_v50 = vld [vmem:[#allocation10 + $0x38] sm:$0xff]   ;;  %v2064_v24 = vld [vmem:[#allocation11] sm:$0xff]   ;;  %v2069_v30 = vld [vmem:[#allocation11 + $0x28] sm:$0xff]  }
  0x9e   :  { %1718 = vmatpush3.bf16.msra.mxu0 %v2027_v4  ;;  %1738 = vmatpush3.bf16.msra.mxu1 %v2027_v4  ;;  %v2072_v33 = vld [vmem:[#allocation10 + $0x40] sm:$0xff]  }
  0x9f   :  { %1719 = vmatprep.subr.bf16.mxu0 %v2324_v0  ;;  %1739 = vmatprep.subr.bf16.mxu1 %v2324_v0 }
  0xa2   :  { %1720 = vmatpush3.bf16.msra.mxu0 %v2028_v5  ;;  %1740 = vmatpush3.bf16.msra.mxu1 %v2028_v5 }
  0xa3   :  { %1721 = vmatprep.subr.bf16.mxu0 %v2324_v0  ;;  %1741 = vmatprep.subr.bf16.mxu1 %v2324_v0 }
  0xa6   :  { %1722 = vmatpush3.bf16.msra.mxu0 %v2029_v8  ;;  %1742 = vmatpush3.bf16.msra.mxu1 %v2029_v8 }
  0xa7   :  { %1723 = vmatprep.subr.bf16.mxu0 %v2324_v0  ;;  %1743 = vmatprep.subr.bf16.mxu1 %v2324_v0 }
  0xaa   :  { %1724 = vmatpush3.bf16.msra.mxu0 %v2030_v10  ;;  %1744 = vmatpush3.bf16.msra.mxu1 %v2030_v10 }
  0xab   :  { %1725 = vmatprep.subr.bf16.mxu0 %v2324_v0  ;;  %1745 = vmatprep.subr.bf16.mxu1 %v2324_v0 }
  0xae   :  { %1726 = vmatpush3.bf16.msra.mxu0 %v2031_v12  ;;  %1746 = vmatpush3.bf16.msra.mxu1 %v2031_v12 }
  0xaf   :  { %1751 = vmatprep.subr.bf16.mxu0 %v2324_v0  ;;  %1771 = vmatprep.subr.bf16.mxu1 %v2324_v0 }
  0xb1   :  { %1728 = vmatmul.mubr.bf16.vlgmr.msra.gmra.mrb[0].mxu0 %v184_v13  ;;  %1748 = vmatmul.mubr.bf16.vlgmr.msra.gmra.mrb[0].mxu1 %v2520_v7 }
  0xb2   :  { %1752 = vmatpush3.bf16.msra.mxu0 %v2032_v14  ;;  %1772 = vmatpush3.bf16.msra.mxu1 %v2033_v15 }
  0xb3   :  { %1753 = vmatprep.subr.bf16.mxu0 %v2324_v0  ;;  %1773 = vmatprep.subr.bf16.mxu1 %v2324_v0 }
  0xb4   :  { %1767 = vmatprep.mubr.msk.bf16.mxu0 %vm2325_vm0, %v2324_v0  ;;  %1787 = vmatprep.mubr.msk.bf16.mxu1 %vm2325_vm0, %v2324_v0 }
  0xb6   :  { %1754 = vmatpush3.bf16.msra.mxu0 %v2034_v16  ;;  %1774 = vmatpush3.bf16.msra.mxu1 %v2531_v17  ;;  %v1522_v16 = vld [vmem:[%s2701_s4] ss:$0 sm:$0xff] }
  0xb7   :  { %1755 = vmatprep.subr.bf16.mxu0 %v2324_v0  ;;  %1775 = vmatprep.subr.bf16.mxu1 %v2324_v0 }
  0xba   :  { %1756 = vmatpush3.bf16.msra.mxu0 %v2036_v18  ;;  %1776 = vmatpush3.bf16.msra.mxu1 %v2037_v19 }
  0xbb   :  { %1757 = vmatprep.subr.bf16.mxu0 %v2324_v0  ;;  %1777 = vmatprep.subr.bf16.mxu1 %v2324_v0 }
  0xbe   :  { %1758 = vmatpush3.bf16.msra.mxu0 %v2038_v20  ;;  %1778 = vmatpush3.bf16.msra.mxu1 %v2039_v21 }
  0xbf   :  { %1759 = vmatprep.subr.bf16.mxu0 %v2324_v0  ;;  %1779 = vmatprep.subr.bf16.mxu1 %v2324_v0 }
  0xc2   :  { %1760 = vmatpush3.bf16.msra.mxu0 %v2040_v22  ;;  %1780 = vmatpush3.bf16.msra.mxu1 %v2041_v23 }
  0xc3   :  { %1761 = vmatprep.subr.bf16.mxu0 %v2324_v0  ;;  %1781 = vmatprep.subr.bf16.mxu1 %v2324_v0 }
  0xc6   :  { %1762 = vmatpush3.bf16.msra.mxu0 %v2042_v25  ;;  %1782 = vmatpush3.bf16.msra.mxu1 %v2043_v26 }
  0xc7   :  { %1763 = vmatprep.subr.bf16.mxu0 %v2324_v0  ;;  %1783 = vmatprep.subr.bf16.mxu1 %v2324_v0 }
  0xca   :  { %1764 = vmatpush3.bf16.msra.mxu0 %v2044_v28  ;;  %1784 = vmatpush3.bf16.msra.mxu1 %v2045_v29  ;;  %v2067_v28 = vld [vmem:[#allocation11 + $0x18] sm:$0xff]  }
  0xcb   :  { %1765 = vmatprep.subr.bf16.mxu0 %v2324_v0  ;;  %1785 = vmatprep.subr.bf16.mxu1 %v2324_v0 }
  0xce   :  { %1766 = vmatpush3.bf16.msra.mxu0 %v2046_v31  ;;  %1786 = vmatpush3.bf16.msra.mxu1 %v2047_v32  ;;  %v2070_v31 = vld [vmem:[#allocation11 + $0x30] sm:$0xff]  }
  0xcf   :  { %1791 = vmatprep.subr.bf16.mxu0 %v2324_v0  ;;  %1811 = vmatprep.subr.bf16.mxu1 %v2324_v0 }
  0xd1   :  { %1768 = vmatmul.mubr.bf16.vlgmr.msra.gmra.mrb[4].mxu0 %v2520_v7  ;;  %1788 = vmatmul.mubr.bf16.vlgmr.msra.gmra.mrb[4].mxu1 %v440_v35  ;;  %v2074_v35 = vld [vmem:[#allocation10 + $0x50] sm:$0xff]  }
  0xd2   :  { %1792 = vmatpush3.bf16.msra.mxu0 %v2033_v15  ;;  %1812 = vmatpush3.bf16.msra.mxu1 %v2048_v34  ;;  %v2073_v34 = vld [vmem:[#allocation10 + $0x48] sm:$0xff]  }
  0xd3   :  { %1793 = vmatprep.subr.bf16.mxu0 %v2324_v0  ;;  %1813 = vmatprep.subr.bf16.mxu1 %v2324_v0 }
  0xd4   :  { %1807 = vmatprep.mubr.msk.bf16.mxu0 %vm2325_vm0, %v2324_v0  ;;  %1827 = vmatprep.mubr.msk.bf16.mxu1 %vm2325_vm0, %v2324_v0 }
  0xd6   :  { %1794 = vmatpush3.bf16.msra.mxu0 %v2531_v17  ;;  %1814 = vmatpush3.bf16.msra.mxu1 %v2049_v36  ;;  %v2075_v36 = vld [vmem:[#allocation10 + $0x58] sm:$0xff]  }
  0xd7   :  { %1795 = vmatprep.subr.bf16.mxu0 %v2324_v0  ;;  %1815 = vmatprep.subr.bf16.mxu1 %v2324_v0 }
  0xda   :  { %1796 = vmatpush3.bf16.msra.mxu0 %v2037_v19  ;;  %1816 = vmatpush3.bf16.msra.mxu1 %v2050_v37  ;;  %v2076_v37 = vld [vmem:[#allocation10 + $0x60] sm:$0xff]  }
  0xdb   :  { %1797 = vmatprep.subr.bf16.mxu0 %v2324_v0  ;;  %1817 = vmatprep.subr.bf16.mxu1 %v2324_v0 }
  0xde   :  { %1798 = vmatpush3.bf16.msra.mxu0 %v2039_v21  ;;  %1818 = vmatpush3.bf16.msra.mxu1 %v2051_v38  ;;  %v2077_v38 = vld [vmem:[#allocation10 + $0x68] sm:$0xff]  }
  0xdf   :  { %1799 = vmatprep.subr.bf16.mxu0 %v2324_v0  ;;  %1819 = vmatprep.subr.bf16.mxu1 %v2324_v0 }
  0xe2   :  { %1800 = vmatpush3.bf16.msra.mxu0 %v2041_v23  ;;  %1820 = vmatpush3.bf16.msra.mxu1 %v2052_v39  ;;  %v2078_v39 = vld [vmem:[#allocation10 + $0x70] sm:$0xff]  }
  0xe3   :  { %1801 = vmatprep.subr.bf16.mxu0 %v2324_v0  ;;  %1821 = vmatprep.subr.bf16.mxu1 %v2324_v0 }
  0xe6   :  { %1802 = vmatpush3.bf16.msra.mxu0 %v2043_v26  ;;  %1822 = vmatpush3.bf16.msra.mxu1 %v2053_v40  ;;  %v2065_v26 = vld [vmem:[#allocation11 + $0x8] sm:$0xff]   ;;  %v2079_v40 = vld [vmem:[#allocation10 + $0x78] sm:$0xff]  }
  0xe7   :  { %1803 = vmatprep.subr.bf16.mxu0 %v2324_v0  ;;  %1823 = vmatprep.subr.bf16.mxu1 %v2324_v0 }
  0xea   :  { %1804 = vmatpush3.bf16.msra.mxu0 %v2045_v29  ;;  %1824 = vmatpush3.bf16.msra.mxu1 %v2054_v41  ;;  %v2068_v29 = vld [vmem:[#allocation11 + $0x20] sm:$0xff]  }
  0xeb   :  { %1805 = vmatprep.subr.bf16.mxu0 %v2324_v0  ;;  %1825 = vmatprep.subr.bf16.mxu1 %v2324_v0 }
  0xee   :  { %1806 = vmatpush3.bf16.msra.mxu0 %v2047_v32  ;;  %1826 = vmatpush3.bf16.msra.mxu1 %v2055_v42  ;;  %v2071_v32 = vld [vmem:[#allocation11 + $0x38] sm:$0xff]  }
  0xef   :  { %1851 = vmatprep.subr.bf16.mxu1 %v2324_v0  ;;  %1831 = vmatprep.subr.bf16.mxu0 %v2324_v0 }
  0xf1   :  { %1808 = vmatmul.mubr.bf16.vlgmr.msra.gmra.mrb[8].mxu0 %v2547_v27  ;;  %1828 = vmatmul.mubr.bf16.vlgmr.msra.gmra.mrb[8].mxu1 %v2547_v27  ;;  %v2066_v27 = vld [vmem:[#allocation11 + $0x10] sm:$0xff]  }
  0xf2   :  { %1867 = vmatprep.mubr.msk.bf16.mxu1 %vm2325_vm0, %v2324_v0  ;;  %1847 = vmatprep.mubr.msk.bf16.mxu0 %vm2325_vm0, %v2324_v0 }
  0xf3   :  { %1852 = vmatpush3.bf16.msra.mxu1 %v2056_v43  ;;  %1832 = vmatpush3.bf16.msra.mxu0 %v2056_v43 }
  0xf4   :  { %1853 = vmatprep.subr.bf16.mxu1 %v2324_v0  ;;  %1833 = vmatprep.subr.bf16.mxu0 %v2324_v0 }
  0xf7   :  { %1854 = vmatpush3.bf16.msra.mxu1 %v2057_v44  ;;  %1834 = vmatpush3.bf16.msra.mxu0 %v2057_v44 }
  0xf8   :  { %1855 = vmatprep.subr.bf16.mxu1 %v2324_v0  ;;  %1835 = vmatprep.subr.bf16.mxu0 %v2324_v0 }
  0xfb   :  { %1856 = vmatpush3.bf16.msra.mxu1 %v2058_v45  ;;  %1836 = vmatpush3.bf16.msra.mxu0 %v2058_v45 }
  0xfc   :  { %1857 = vmatprep.subr.bf16.mxu1 %v2324_v0  ;;  %1837 = vmatprep.subr.bf16.mxu0 %v2324_v0 }
  0xff   :  { %1858 = vmatpush3.bf16.msra.mxu1 %v2059_v46  ;;  %1838 = vmatpush3.bf16.msra.mxu0 %v2059_v46 }
 0x100   :  { %1859 = vmatprep.subr.bf16.mxu1 %v2324_v0  ;;  %1839 = vmatprep.subr.bf16.mxu0 %v2324_v0 }
 0x103   :  { %1860 = vmatpush3.bf16.msra.mxu1 %v2060_v47  ;;  %1840 = vmatpush3.bf16.msra.mxu0 %v2060_v47 }
 0x104   :  { %1861 = vmatprep.subr.bf16.mxu1 %v2324_v0  ;;  %1841 = vmatprep.subr.bf16.mxu0 %v2324_v0 }
 0x107   :  { %1862 = vmatpush3.bf16.msra.mxu1 %v2061_v48  ;;  %1842 = vmatpush3.bf16.msra.mxu0 %v2061_v48 }
 0x108   :  { %1863 = vmatprep.subr.bf16.mxu1 %v2324_v0  ;;  %1843 = vmatprep.subr.bf16.mxu0 %v2324_v0 }
 0x10b   :  { %1864 = vmatpush3.bf16.msra.mxu1 %v2062_v49  ;;  %1844 = vmatpush3.bf16.msra.mxu0 %v2062_v49 }
 0x10c   :  { %1865 = vmatprep.subr.bf16.mxu1 %v2324_v0  ;;  %1845 = vmatprep.subr.bf16.mxu0 %v2324_v0 }
 0x10f   :  { %1866 = vmatpush3.bf16.msra.mxu1 %v2063_v50  ;;  %1846 = vmatpush3.bf16.msra.mxu0 %v2063_v50 }
 0x110   :  { %1871 = vmatprep.subr.bf16.mxu0 %v2324_v0  ;;  %1891 = vmatprep.subr.bf16.mxu1 %v2324_v0 }
 0x184   :  { %v267_v51 = vpop.f32.mrb[0].mxu0  ;;  %v307_v52 = vpop.f32.mrb[0].mxu1 }
 0x185   :  { %v308_v53 = vadd.f32 %v307_v52, %v267_v51  ;;  %v1729_v54 = vpop.f32.mrb[1].mxu0  ;;  %v1749_v55 = vpop.f32.mrb[1].mxu1  ;;  %v1539_v51 = vld [vmem:[%s2704_s7] ss:$0 sm:$0xff] }
 0x186   :  { %v270_v56 = vpop.f32.mrb[2].mxu0  ;;  %v310_v57 = vpop.f32.mrb[2].mxu1 }
 0x187   :  { %v1730_v58 = vpop.f32.mrb[3].mxu0  ;;  %v1750_v59 = vpop.f32.mrb[3].mxu1 }
 0x1a4   :  { %v395_v60 = vpop.f32.mrb[4].mxu0  ;;  %v523_v61 = vpop.f32.mrb[4].mxu1 }
 0x1a5   :  { %v401_v62 = vadd.f32 %v395_v60, %v308_v53  ;;  %v1769_v63 = vpop.f32.mrb[5].mxu0  ;;  %v1789_v1 = vpop.f32.mrb[5].mxu1 }
 0x1a6   :  { %v398_v2 = vpop.f32.mrb[6].mxu0  ;;  %v526_v3 = vpop.f32.mrb[6].mxu1  ;;  %v2081_v1 = vld [vmem:[#allocation11 + $0x48] sm:$0xff]  }
 0x1a7   :  { %v1770_v4 = vpop.f32.mrb[7].mxu0  ;;  %v1790_v5 = vpop.f32.mrb[7].mxu1  ;;  %v2082_v2 = vld [vmem:[#allocation11 + $0x50] sm:$0xff]   ;;  %v2083_v3 = vld [vmem:[#allocation11 + $0x58] sm:$0xff]  }
 0x1a8   :  { %v2084_v4 = vld [vmem:[#allocation11 + $0x60] sm:$0xff]   ;;  %v2085_v5 = vld [vmem:[#allocation11 + $0x68] sm:$0xff]  }
 0x1c4   :  { %v563_v6 = vpop.f32.mrb[8].mxu0  ;;  %v651_v7 = vpop.f32.mrb[8].mxu1 }
 0x1c5   :  { %v564_v8 = vadd.f32 %v563_v6, %v523_v61  ;;  %v1809_v9 = vpop.f32.mrb[9].mxu0  ;;  %v1829_v10 = vpop.f32.mrb[9].mxu1  ;;  %v2086_v6 = vld [vmem:[#allocation11 + $0x70] sm:$0xff]  }
 0x1c6   :  { %v566_v11 = vpop.f32.mrb[10].mxu0  ;;  %v654_v12 = vpop.f32.mrb[10].mxu1  ;;  %v2089_v9 = vld [vmem:[#allocation13 + $0x8] sm:$0xff]   ;;  %v2090_v10 = vld [vmem:[#allocation13 + $0x10] sm:$0xff]  }
 0x1c7   :  { %v657_v13 = vadd.f32 %v651_v7, %v564_v8  ;;  %v1810_v14 = vpop.f32.mrb[11].mxu0  ;;  %v1830_v15 = vpop.f32.mrb[11].mxu1  ;;  %v2087_v7 = vld [vmem:[#allocation11 + $0x78] sm:$0xff]   ;;  %v2088_v8 = vld [vmem:[#allocation13] sm:$0xff]  }
 0x1c8   :  { %v2091_v11 = vld [vmem:[#allocation13 + $0x18] sm:$0xff]   ;;  %v2092_v12 = vld [vmem:[#allocation13 + $0x20] sm:$0xff]   ;;  %v2094_v14 = vld [vmem:[#allocation13 + $0x30] sm:$0xff]  }
 0x1c9   :  { %v658_v17 = vadd.f32 %v657_v13, %v401_v62  ;;  %v2080_v62 = vld [vmem:[#allocation11 + $0x40] sm:$0xff]   ;;  %v2093_v13 = vld [vmem:[#allocation13 + $0x28] sm:$0xff]   ;;  %v2095_v15 = vld [vmem:[#allocation13 + $0x38] sm:$0xff]  }
 0x1cb   :  { %v666_v18 = vadd.f32 %v1522_v16, %v658_v17 }
 0x1cd   :  { %vm667_vm1 = vcmp.ge.f32.partialorder %v666_v18, 0.0  ;;  %v668_v19 = vmul.f32 0.01, %v666_v18 }
 0x1cf   :  { %v669_v20 = vsel %vm667_vm1, %v666_v18, %v668_v19 }
 0x1d0   :  { %v702_v21 = vpack.c.bf16 %v669_v20, %v669_v20 }
 0x1d2   :  { %1868 = vmatmul.mubr.bf16.vlgmr.msra.gmra.mrb[12].mxu1 %v702_v21  ;;  %v703_v22 = vunpack.c.l.bf16 %v702_v21 }
 0x1d3   :  { %1907 = vmatprep.mubr.msk.bf16.mxu1 %vm2325_vm0, %v2324_v0  ;;  %1892 = vmatpush3.bf16.msra.mxu1 %v2072_v33 }
 0x1d4   :  { %v704_v23 = vsub.f32 %v669_v20, %v703_v22  ;;  %1893 = vmatprep.subr.bf16.mxu1 %v2324_v0 }
 0x1d6   :  { %v705_v25 = vpack.c.bf16 %v704_v23, %v704_v23 }
 0x1d7   :  { %1894 = vmatpush3.bf16.msra.mxu1 %v2073_v34 }
 0x1d8   :  { %1848 = vmatmul.mubr.bf16.vlgmr.msra.gmra.mrb[12].mxu0 %v705_v25  ;;  %1895 = vmatprep.subr.bf16.mxu1 %v2324_v0 }
 0x1d9   :  { %1872 = vmatpush3.bf16.msra.mxu0 %v2064_v24  ;;  %1887 = vmatprep.mubr.msk.bf16.mxu0 %vm2325_vm0, %v2324_v0 }
 0x1da   :  { %1873 = vmatprep.subr.bf16.mxu0 %v2324_v0 }
 0x1db   :  { %1896 = vmatpush3.bf16.msra.mxu1 %v2074_v35 }
 0x1dc   :  { %1897 = vmatprep.subr.bf16.mxu1 %v2324_v0 }
 0x1dd   :  { %1874 = vmatpush3.bf16.msra.mxu0 %v2065_v26  ;;  %v1557_v26 = vld [vmem:[%s2704_s7 + $0x1] ss:$0 sm:$0xff] }
 0x1de   :  { %1875 = vmatprep.subr.bf16.mxu0 %v2324_v0 }
 0x1df   :  { %1898 = vmatpush3.bf16.msra.mxu1 %v2075_v36 }
 0x1e0   :  { %1899 = vmatprep.subr.bf16.mxu1 %v2324_v0 }
 0x1e1   :  { %1876 = vmatpush3.bf16.msra.mxu0 %v2066_v27 }
 0x1e2   :  { %1877 = vmatprep.subr.bf16.mxu0 %v2324_v0 }
 0x1e3   :  { %1900 = vmatpush3.bf16.msra.mxu1 %v2076_v37 }
 0x1e4   :  { %1901 = vmatprep.subr.bf16.mxu1 %v2324_v0 }
 0x1e5   :  { %1878 = vmatpush3.bf16.msra.mxu0 %v2067_v28 }
 0x1e6   :  { %1879 = vmatprep.subr.bf16.mxu0 %v2324_v0 }
 0x1e7   :  { %1902 = vmatpush3.bf16.msra.mxu1 %v2077_v38 }
 0x1e8   :  { %1903 = vmatprep.subr.bf16.mxu1 %v2324_v0 }
 0x1e9   :  { %1880 = vmatpush3.bf16.msra.mxu0 %v2068_v29 }
 0x1ea   :  { %1881 = vmatprep.subr.bf16.mxu0 %v2324_v0 }
 0x1eb   :  { %1904 = vmatpush3.bf16.msra.mxu1 %v2078_v39 }
 0x1ec   :  { %1905 = vmatprep.subr.bf16.mxu1 %v2324_v0 }
 0x1ed   :  { %1882 = vmatpush3.bf16.msra.mxu0 %v2069_v30 }
 0x1ee   :  { %1883 = vmatprep.subr.bf16.mxu0 %v2324_v0 }
 0x1ef   :  { %1906 = vmatpush3.bf16.msra.mxu1 %v2079_v40 }
 0x1f0   :  { %1931 = vmatprep.subr.bf16.mxu1 %v2324_v0 }
 0x1f1   :  { %1884 = vmatpush3.bf16.msra.mxu0 %v2070_v31 }
 0x1f2   :  { %1885 = vmatprep.subr.bf16.mxu0 %v2324_v0 }
 0x1f5   :  { %1886 = vmatpush3.bf16.msra.mxu0 %v2071_v32 }
 0x1f6   :  { %1911 = vmatprep.subr.bf16.mxu0 %v2324_v0 }
 0x1f8   :  { %1888 = vmatmul.mubr.bf16.vlgmr.msra.gmra.mrb[16].mxu0 %v702_v21 }
 0x1f9   :  { %1927 = vmatprep.mubr.msk.bf16.mxu0 %vm2325_vm0, %v2324_v0  ;;  %1912 = vmatpush3.bf16.msra.mxu0 %v2072_v33 }
 0x1fa   :  { %1913 = vmatprep.subr.bf16.mxu0 %v2324_v0 }
 0x1fd   :  { %1914 = vmatpush3.bf16.msra.mxu0 %v2073_v34 }
 0x1fe   :  { %1915 = vmatprep.subr.bf16.mxu0 %v2324_v0 }
 0x201   :  { %1916 = vmatpush3.bf16.msra.mxu0 %v2074_v35 }
 0x202   :  { %1917 = vmatprep.subr.bf16.mxu0 %v2324_v0 }
 0x205   :  { %1918 = vmatpush3.bf16.msra.mxu0 %v2075_v36 }
 0x206   :  { %1919 = vmatprep.subr.bf16.mxu0 %v2324_v0 }
 0x209   :  { %1920 = vmatpush3.bf16.msra.mxu0 %v2076_v37  ;;  %v2096_v37 = vld [vmem:[#allocation14] sm:$0xff]  }
 0x20a   :  { %1921 = vmatprep.subr.bf16.mxu0 %v2324_v0 }
 0x20d   :  { %1922 = vmatpush3.bf16.msra.mxu0 %v2077_v38 }
 0x20e   :  { %1923 = vmatprep.subr.bf16.mxu0 %v2324_v0 }
 0x211   :  { %1924 = vmatpush3.bf16.msra.mxu0 %v2078_v39  ;;  %v2097_v39 = vld [vmem:[#allocation14 + $0x8] sm:$0xff]  }
 0x212   :  { %1925 = vmatprep.subr.bf16.mxu0 %v2324_v0 }
 0x215   :  { %1926 = vmatpush3.bf16.msra.mxu0 %v2079_v40  ;;  %v2098_v40 = vld [vmem:[#allocation14 + $0x10] sm:$0xff]  }
 0x216   :  { %1951 = vmatprep.subr.bf16.mxu0 %v2324_v0 }
 0x2a5   :  { %v828_v41 = vpop.f32.mrb[12].mxu1 }
 0x2a6   :  { %v1869_v42 = vpop.f32.mrb[13].mxu1 }
 0x2a7   :  { %v831_v43 = vpop.f32.mrb[14].mxu1  ;;  %v2100_v42 = vld [vmem:[#allocation14 + $0x20] sm:$0xff]  }
 0x2a8   :  { %v1870_v44 = vpop.f32.mrb[15].mxu1  ;;  %v2101_v43 = vld [vmem:[#allocation14 + $0x28] sm:$0xff]  }
 0x2a9   :  { %v2102_v44 = vld [vmem:[#allocation14 + $0x30] sm:$0xff]  }
 0x2ab   :  { %v788_v45 = vpop.f32.mrb[12].mxu0 }
 0x2ac   :  { %v829_v46 = vadd.f32 %v828_v41, %v788_v45  ;;  %v1849_v47 = vpop.f32.mrb[13].mxu0  ;;  %v2099_v41 = vld [vmem:[#allocation14 + $0x18] sm:$0xff]  }
 0x2ad   :  { %v791_v48 = vpop.f32.mrb[14].mxu0  ;;  %v2103_v45 = vld [vmem:[#allocation14 + $0x38] sm:$0xff]  }
 0x2ae   :  { %v1850_v49 = vpop.f32.mrb[15].mxu0 }
 0x2cb   :  { %v916_v50 = vpop.f32.mrb[16].mxu0 }
 0x2cc   :  { %v922_v52 = vadd.f32 %v916_v50, %v829_v46  ;;  %v1889_v53 = vpop.f32.mrb[17].mxu0 }
 0x2cd   :  { %v919_v54 = vpop.f32.mrb[18].mxu0 }
 0x2ce   :  { %v930_v55 = vadd.f32 %v1539_v51, %v922_v52  ;;  %v1890_v56 = vpop.f32.mrb[19].mxu0 }
 0x2cf   :  { %v1574_v56 = vld [vmem:[%s2707_s10] ss:$0 sm:$0xff] }
 0x2d0   :  { %vm931_vm2 = vcmp.ge.f32.partialorder %v930_v55, 0.0  ;;  %v932_v57 = vmul.f32 0.01, %v930_v55 }
 0x2d2   :  { %v933_v58 = vsel %vm931_vm2, %v930_v55, %v932_v57 }
 0x2d3   :  { %v968_v59 = vpack.c.bf16 %v933_v58, %v933_v58 }
 0x2d5   :  { %1928 = vmatmul.mubr.bf16.vlgmr.msra.gmra.mrb[20].mxu0 %v968_v59  ;;  %v969_v60 = vunpack.c.l.bf16 %v968_v59 }
 0x2d6   :  { %1967 = vmatprep.mubr.msk.bf16.mxu0 %vm2325_vm0, %v2324_v0  ;;  %1952 = vmatpush3.bf16.msra.mxu0 %v2088_v8 }
 0x2d7   :  { %v970_v61 = vsub.f32 %v933_v58, %v969_v60  ;;  %1953 = vmatprep.subr.bf16.mxu0 %v2324_v0 }
 0x2d9   :  { %v971_v63 = vpack.c.bf16 %v970_v61, %v970_v61 }
 0x2da   :  { %1954 = vmatpush3.bf16.msra.mxu0 %v2089_v9 }
 0x2db   :  { %1908 = vmatmul.mubr.bf16.vlgmr.msra.gmra.mrb[16].mxu1 %v971_v63  ;;  %1955 = vmatprep.subr.bf16.mxu0 %v2324_v0 }
 0x2dc   :  { %1932 = vmatpush3.bf16.msra.mxu1 %v2080_v62  ;;  %1947 = vmatprep.mubr.msk.bf16.mxu1 %vm2325_vm0, %v2324_v0 }
 0x2dd   :  { %1933 = vmatprep.subr.bf16.mxu1 %v2324_v0 }
 0x2de   :  { %1956 = vmatpush3.bf16.msra.mxu0 %v2090_v10 }
 0x2df   :  { %1957 = vmatprep.subr.bf16.mxu0 %v2324_v0 }
 0x2e0   :  { %1934 = vmatpush3.bf16.msra.mxu1 %v2081_v1 }
 0x2e1   :  { %1935 = vmatprep.subr.bf16.mxu1 %v2324_v0 }
 0x2e2   :  { %1958 = vmatpush3.bf16.msra.mxu0 %v2091_v11 }
 0x2e3   :  { %1959 = vmatprep.subr.bf16.mxu0 %v2324_v0 }
 0x2e4   :  { %1936 = vmatpush3.bf16.msra.mxu1 %v2082_v2 }
 0x2e5   :  { %1937 = vmatprep.subr.bf16.mxu1 %v2324_v0 }
 0x2e6   :  { %1960 = vmatpush3.bf16.msra.mxu0 %v2092_v12 }
 0x2e7   :  { %1961 = vmatprep.subr.bf16.mxu0 %v2324_v0 }
 0x2e8   :  { %1938 = vmatpush3.bf16.msra.mxu1 %v2083_v3 }
 0x2e9   :  { %1939 = vmatprep.subr.bf16.mxu1 %v2324_v0 }
 0x2ea   :  { %1962 = vmatpush3.bf16.msra.mxu0 %v2093_v13 }
 0x2eb   :  { %1963 = vmatprep.subr.bf16.mxu0 %v2324_v0 }
 0x2ec   :  { %1940 = vmatpush3.bf16.msra.mxu1 %v2084_v4 }
 0x2ed   :  { %1941 = vmatprep.subr.bf16.mxu1 %v2324_v0 }
 0x2ee   :  { %1964 = vmatpush3.bf16.msra.mxu0 %v2094_v14 }
 0x2ef   :  { %1965 = vmatprep.subr.bf16.mxu0 %v2324_v0 }
 0x2f0   :  { %1942 = vmatpush3.bf16.msra.mxu1 %v2085_v5 }
 0x2f1   :  { %1943 = vmatprep.subr.bf16.mxu1 %v2324_v0 }
 0x2f2   :  { %1966 = vmatpush3.bf16.msra.mxu0 %v2095_v15 }
 0x2f3   :  { %1991 = vmatprep.subr.bf16.mxu0 %v2324_v0 }
 0x2f4   :  { %1944 = vmatpush3.bf16.msra.mxu1 %v2086_v6 }
 0x2f5   :  { %1945 = vmatprep.subr.bf16.mxu1 %v2324_v0 }
 0x2f8   :  { %1946 = vmatpush3.bf16.msra.mxu1 %v2087_v7 }
 0x2f9   :  { %1971 = vmatprep.subr.bf16.mxu1 %v2324_v0 }
 0x2fb   :  { %1948 = vmatmul.mubr.bf16.vlgmr.msra.gmra.mrb[20].mxu1 %v968_v59 }
 0x2fc   :  { %1987 = vmatprep.mubr.msk.bf16.mxu1 %vm2325_vm0, %v2324_v0  ;;  %1972 = vmatpush3.bf16.msra.mxu1 %v2088_v8 }
 0x2fd   :  { %1973 = vmatprep.subr.bf16.mxu1 %v2324_v0 }
 0x300   :  { %1974 = vmatpush3.bf16.msra.mxu1 %v2089_v9 }
 0x301   :  { %1975 = vmatprep.subr.bf16.mxu1 %v2324_v0 }
 0x304   :  { %1976 = vmatpush3.bf16.msra.mxu1 %v2090_v10 }
 0x305   :  { %1977 = vmatprep.subr.bf16.mxu1 %v2324_v0 }
 0x308   :  { %1978 = vmatpush3.bf16.msra.mxu1 %v2091_v11 }
 0x309   :  { %1979 = vmatprep.subr.bf16.mxu1 %v2324_v0 }
 0x30c   :  { %1980 = vmatpush3.bf16.msra.mxu1 %v2092_v12 }
 0x30d   :  { %1981 = vmatprep.subr.bf16.mxu1 %v2324_v0 }
 0x310   :  { %1982 = vmatpush3.bf16.msra.mxu1 %v2093_v13 }
 0x311   :  { %1983 = vmatprep.subr.bf16.mxu1 %v2324_v0 }
 0x314   :  { %1984 = vmatpush3.bf16.msra.mxu1 %v2094_v14 }
 0x315   :  { %1985 = vmatprep.subr.bf16.mxu1 %v2324_v0 }
 0x318   :  { %1986 = vmatpush3.bf16.msra.mxu1 %v2095_v15 }
 0x3a8   :  { %v1094_v16 = vpop.f32.mrb[20].mxu0 }
 0x3a9   :  { %v1929_v17 = vpop.f32.mrb[21].mxu0 }
 0x3aa   :  { %v1097_v18 = vpop.f32.mrb[22].mxu0 }
 0x3ab   :  { %v1930_v19 = vpop.f32.mrb[23].mxu0 }
 0x3ae   :  { %v1054_v20 = vpop.f32.mrb[16].mxu1 }
 0x3af   :  { %v1095_v21 = vadd.f32 %v1094_v16, %v1054_v20  ;;  %v1909_v22 = vpop.f32.mrb[17].mxu1 }
 0x3b0   :  { %v1057_v23 = vpop.f32.mrb[18].mxu1 }
 0x3b1   :  { %v1910_v24 = vpop.f32.mrb[19].mxu1 }
 0x3ce   :  { %v1182_v25 = vpop.f32.mrb[20].mxu1 }
 0x3cf   :  { %v1188_v27 = vadd.f32 %v1182_v25, %v1095_v21  ;;  %v1949_v28 = vpop.f32.mrb[21].mxu1 }
 0x3d0   :  { %v1185_v29 = vpop.f32.mrb[22].mxu1 }
 0x3d1   :  { %v1197_v30 = vadd.f32 %v1557_v26, %v1188_v27  ;;  %v1950_v31 = vpop.f32.mrb[23].mxu1 }
 0x3d3   :  { %vm1198_vm3 = vcmp.ge.f32.partialorder %v1197_v30, 0.0  ;;  %v1199_v32 = vmul.f32 0.01, %v1197_v30 }
 0x3d5   :  { %v1200_v33 = vsel %vm1198_vm3, %v1197_v30, %v1199_v32 }
 0x3d6   :  { %v1233_v34 = vpack.c.bf16 %v1200_v33, %v1200_v33 }
 0x3d8   :  { %1988 = vmatmul.mubr.bf16.vlgmr.msra.gmra.mrb[24].mxu1 %v1233_v34  ;;  %v1234_v35 = vunpack.c.l.bf16 %v1233_v34 }
 0x3da   :  { %v1235_v36 = vsub.f32 %v1200_v33, %v1234_v35 }
 0x3dc   :  { %v1236_v38 = vpack.c.bf16 %v1235_v36, %v1235_v36 }
 0x3de   :  { %1968 = vmatmul.mubr.bf16.vlgmr.msra.gmra.mrb[24].mxu0 %v1236_v38 }
 0x3df   :  { %1992 = vmatpush3.bf16.msra.mxu0 %v2096_v37  ;;  %2007 = vmatprep.mubr.msk.bf16.mxu0 %vm2325_vm0, %v2324_v0 }
 0x3e0   :  { %1993 = vmatprep.subr.bf16.mxu0 %v2324_v0 }
 0x3e3   :  { %1994 = vmatpush3.bf16.msra.mxu0 %v2097_v39 }
 0x3e4   :  { %1995 = vmatprep.subr.bf16.mxu0 %v2324_v0 }
 0x3e7   :  { %1996 = vmatpush3.bf16.msra.mxu0 %v2098_v40 }
 0x3e8   :  { %1997 = vmatprep.subr.bf16.mxu0 %v2324_v0 }
 0x3eb   :  { %1998 = vmatpush3.bf16.msra.mxu0 %v2099_v41 }
 0x3ec   :  { %1999 = vmatprep.subr.bf16.mxu0 %v2324_v0 }
 0x3ef   :  { %2000 = vmatpush3.bf16.msra.mxu0 %v2100_v42 }
 0x3f0   :  { %2001 = vmatprep.subr.bf16.mxu0 %v2324_v0 }
 0x3f3   :  { %2002 = vmatpush3.bf16.msra.mxu0 %v2101_v43 }
 0x3f4   :  { %2003 = vmatprep.subr.bf16.mxu0 %v2324_v0 }
 0x3f7   :  { %2004 = vmatpush3.bf16.msra.mxu0 %v2102_v44 }
 0x3f8   :  { %2005 = vmatprep.subr.bf16.mxu0 %v2324_v0  ;;  %v1575_v0 = vld [vmem:[%s2708_s11] ss:$0 sm:$0xff] }
 0x3fb   :  { %2006 = vmatpush3.bf16.msra.mxu0 %v2103_v45 }
 0x3fe   :  { %2008 = vmatmul.mubr.bf16.vlgmr.msra.gmra.mrb[28].mxu0 %v1233_v34 }
 0x4ab   :  { %v1359_v46 = vpop.f32.mrb[24].mxu1 }
 0x4ac   :  { %v1989_v47 = vpop.f32.mrb[25].mxu1 }
 0x4ad   :  { %v1362_v48 = vpop.f32.mrb[26].mxu1 }
 0x4ae   :  { %v1990_v49 = vpop.f32.mrb[27].mxu1 }
 0x4b1   :  { %v1319_v50 = vpop.f32.mrb[24].mxu0 }
 0x4b2   :  { %v1360_v51 = vadd.f32 %v1359_v46, %v1319_v50  ;;  %v1969_v52 = vpop.f32.mrb[25].mxu0 }
 0x4b3   :  { %v1322_v53 = vpop.f32.mrb[26].mxu0 }
 0x4b4   :  { %v1970_v54 = vpop.f32.mrb[27].mxu0 }
 0x4d1   :  { %v1447_v55 = vpop.f32.mrb[28].mxu0 }
 0x4d2   :  { %v1453_v57 = vadd.f32 %v1447_v55, %v1360_v51  ;;  %v2009_v58 = vpop.f32.mrb[29].mxu0 }
 0x4d3   :  { %v1450_v59 = vpop.f32.mrb[30].mxu0 }
 0x4d4   :  { %v1461_v60 = vadd.f32 %v1574_v56, %v1453_v57  ;;  %v2010_v61 = vpop.f32.mrb[31].mxu0 }
 0x4d6   :  { %v1469_v62 = vadd.f32 %v1575_v0, %v1461_v60 }
 0x4d8   :  { %1470 = vst [vmem:[#allocation16] sm:$0xff] %v1469_v62 }
 0x4d9   :  { %2291 = shalt.err (!%p2288_p12)
}
 0x4da   :  { %s2292_s5 = scalar_lea.hbm %s2709_s12, 128 }
 0x4db   :  { %p2293_p13 = scmp.ne.s32.totalorder %s2709_s12, %s2292_s5  ;;  %p2296_p0 = scmp.lt.u32.totalorder %s2292_s5, %s2709_s12 }
 0x4dd   :  { %p2298_p1 = pnand %p2296_p0, %p2293_p13 }
 0x4df   :  { %2301 = shalt.err (!%p2298_p1)
}
 0x4e0   :  { %1480 = dma.vmem_to_hbm [thread:$0]  %s1478_s0, 128, %s2709_s12, [#allocation4]  }
 0x4e1   :  { %2312 = dma.done.wait [#allocation4], 128  }
 0x4e2   :  { %2313 = vsyncadd [#allocation4], 4294967168 }
 0x4e3   :  { %1484 = vsyncpa [#allocation3], 1 }
 0x4e4   :  { %1485 = vsyncpa [#allocation6], 1 }
 0x4e5   :  { %1486 = vsyncpa [#allocation9], 1 }
 0x4e6   :  { %1487 = vsyncpa [#allocation12], 1 }
 0x4e7   :  { %1488 = vsyncpa [#allocation15], 1 }
 0x4e8   :  { %1489 = vsyncpa [#allocation4], 1 }

// kernel: tpu_custom_call.1
= control target key start
LH: loop header
LB: loop body
LE: loop exit
PB: predicated region body
PF: predicated region fallthrough
CT: control target
= control target key end

     0   :  { %17 = vsyncpa [#allocation3], 0  ;;  %s2697_s0 = inlined_call_operand.hbm [shape: f32[8,128], index: 0, kind: input, shape index: {}]   ;;  %s2698_s1 = inlined_call_operand.hbm [shape: f32[8,128], index: 1, kind: input, shape index: {}]   ;;  %s2699_s2 = inlined_call_operand.hbm [shape: bf16[2,128,128], index: 2, kind: input, shape index: {}]   ;;  %s2700_s3 = inlined_call_operand.hbm [shape: bf16[2,128,128], index: 3, kind: input, shape index: {}]   ;;  %s2701_s4 = inlined_call_operand.vmem [shape: f32[1,128], index: 4, kind: input, shape index: {}]   ;;  %s2702_s5 = inlined_call_operand.hbm [shape: bf16[2,128,128], index: 5, kind: input, shape index: {}]   ;;  %s2703_s6 = inlined_call_operand.hbm [shape: bf16[2,128,128], index: 6, kind: input, shape index: {}]   ;;  %s2704_s7 = inlined_call_operand.vmem [shape: f32[2,1,128], index: 7, kind: input, shape index: {}]   ;;  %s2705_s8 = inlined_call_operand.hbm [shape: bf16[128,128], index: 8, kind: input, shape index: {}]   ;;  %s2706_s9 = inlined_call_operand.hbm [shape: bf16[128,128], index: 9, kind: input, shape index: {}]   ;;  %s2707_s10 = inlined_call_operand.vmem [shape: f32[1,128], index: 10, kind: input, shape index: {}]   ;;  %s2708_s11 = inlined_call_operand.vmem [shape: f32[1,128], index: 11, kind: input, shape index: {}]   ;;  %s2709_s12 = inlined_call_operand.hbm [shape: f32[8,128], index: 12, kind: output, shape index: {}]  }
   0x1   :  { %18 = vsyncpa [#allocation6], 0 }
   0x2   :  { %19 = vsyncpa [#allocation9], 0 }
   0x3   :  { %20 = vsyncpa [#allocation12], 0 }
   0x4   :  { %21 = vsyncpa [#allocation15], 0 }
   0x5   :  { %22 = vsyncpa [#allocation4], 0  ;;  %s2314_s21 = smov [#allocation5]   ;;  %s2104_s25 = scalar_lea.hbm %s2698_s1, 128 }
   0x6   :  { %s39_s22 = sshll.u32 %s2314_s21, 4  ;;  %p2105_p0 = scmp.ne.s32.totalorder %s2698_s1, %s2104_s25  ;;  %s40_s22 = int_to_ptr.vmem [resolvable:$true] %s39_s22 }
   0x7   :  { %p2108_p1 = scmp.lt.u32.totalorder %s2104_s25, %s2698_s1 }
   0x9   :  { %p2110_p2 = pnand %p2108_p1, %p2105_p0 }
   0xb   :  { %2113 = shalt.err (!%p2110_p2)
}
   0xc   :  { %s2114_s30 = scalar_lea.vmem %s40_s22, 128  ;;  %p2119_p4 = scmp.lt.s32.totalorder %s40_s22, %s40_s22 }
   0xd   :  { %p2115_p3 = scmp.ne.s32.totalorder %s40_s22, %s2114_s30  ;;  %p2120_p5 = scmp.lt.s32.totalorder %s2114_s30, %s2114_s30 }
   0xf   :  { %p2121_p6 = por %p2120_p5, %p2119_p4 }
  0x11   :  { %p2122_p7 = pnand %p2121_p6, %p2115_p3 }
  0x13   :  { %2125 = shalt.err (!%p2122_p7)
}
  0x14   :  { %42 = dma.hbm_to_vmem [thread:$0]  %s2698_s1, 128, %s40_s22, [#allocation6]  }
  0x15   :  { %s2315_s15 = smov [#allocation8]   ;;  %s2316_s17 = smov [#allocation11]  }
  0x16   :  { %s60_s16 = sshll.u32 %s2315_s15, 4  ;;  %s86_s18 = sshll.u32 %s2316_s17, 4  ;;  %s61_s16 = int_to_ptr.vmem [resolvable:$true] %s60_s16  ;;  %s87_s18 = int_to_ptr.vmem [resolvable:$true] %s86_s18 }
  0x17   :  { %s2126_s21 = scalar_lea.hbm %s2700_s3, 2048 }
  0x18   :  { %p2127_p8 = scmp.ne.s32.totalorder %s2700_s3, %s2126_s21  ;;  %p2130_p9 = scmp.lt.u32.totalorder %s2126_s21, %s2700_s3 }
  0x1a   :  { %p2132_p10 = pnand %p2130_p9, %p2127_p8 }
  0x1c   :  { %2135 = shalt.err (!%p2132_p10)
}
  0x1d   :  { %s2136_s1 = scalar_lea.vmem %s61_s16, 2048  ;;  %p2141_p12 = scmp.lt.s32.totalorder %s61_s16, %s61_s16 }
  0x1e   :  { %p2137_p11 = scmp.ne.s32.totalorder %s61_s16, %s2136_s1  ;;  %p2142_p13 = scmp.lt.s32.totalorder %s2136_s1, %s2136_s1 }
  0x20   :  { %p2143_p0 = por %p2142_p13, %p2141_p12 }
  0x22   :  { %p2144_p1 = pnand %p2143_p0, %p2137_p11 }
  0x24   :  { %2147 = shalt.err (!%p2144_p1)
}
  0x25   :  { %s2317_s22 = smov 64   ;;  %s2318_s27 = smov 4  }
  0x26   :  { %66 = dma.hbm_to_vmem [thread:$0]  %s2700_s3, 2048, %s61_s16, [#allocation9], %s2317_s22, %s2317_s22, %s2318_s27  }
  0x27   :  { %s2148_s14 = scalar_lea.hbm %s2703_s6, 2048 }
  0x28   :  { %p2149_p2 = scmp.ne.s32.totalorder %s2703_s6, %s2148_s14  ;;  %p2152_p3 = scmp.lt.u32.totalorder %s2148_s14, %s2703_s6 }
  0x2a   :  { %p2154_p4 = pnand %p2152_p3, %p2149_p2 }
  0x2c   :  { %2157 = shalt.err (!%p2154_p4)
}
  0x2d   :  { %s2158_s21 = scalar_lea.vmem %s87_s18, 2048  ;;  %p2163_p6 = scmp.lt.s32.totalorder %s87_s18, %s87_s18 }
  0x2e   :  { %p2159_p5 = scmp.ne.s32.totalorder %s87_s18, %s2158_s21  ;;  %p2164_p7 = scmp.lt.s32.totalorder %s2158_s21, %s2158_s21 }
  0x30   :  { %p2165_p8 = por %p2164_p7, %p2163_p6 }
  0x32   :  { %p2166_p9 = pnand %p2165_p8, %p2159_p5 }
  0x34   :  { %2169 = shalt.err (!%p2166_p9)
}
  0x35   :  { %92 = dma.hbm_to_vmem [thread:$0]  %s2703_s6, 2048, %s87_s18, [#allocation12], %s2317_s22, %s2317_s22, %s2318_s27  }
  0x36   :  { %s2319_s23 = smov [#allocation2]   ;;  %s2320_s25 = smov [#allocation7]  }
  0x37   :  { %s29_s24 = sshll.u32 %s2319_s23, 4  ;;  %s48_s26 = sshll.u32 %s2320_s25, 4  ;;  %s30_s24 = int_to_ptr.vmem [resolvable:$true] %s29_s24  ;;  %s49_s26 = int_to_ptr.vmem [resolvable:$true] %s48_s26 }
  0x38   :  { %s2170_s29 = scalar_lea.hbm %s2697_s0, 128 }
  0x39   :  { %p2171_p10 = scmp.ne.s32.totalorder %s2697_s0, %s2170_s29  ;;  %p2174_p11 = scmp.lt.u32.totalorder %s2170_s29, %s2697_s0 }
  0x3b   :  { %p2176_p12 = pnand %p2174_p11, %p2171_p10 }
  0x3d   :  { %2179 = shalt.err (!%p2176_p12)
}
  0x3e   :  { %s2180_s6 = scalar_lea.vmem %s30_s24, 128  ;;  %p2185_p0 = scmp.lt.s32.totalorder %s30_s24, %s30_s24 }
  0x3f   :  { %p2181_p13 = scmp.ne.s32.totalorder %s30_s24, %s2180_s6  ;;  %p2186_p1 = scmp.lt.s32.totalorder %s2180_s6, %s2180_s6 }
  0x41   :  { %p2187_p2 = por %p2186_p1, %p2185_p0 }
  0x43   :  { %p2188_p3 = pnand %p2187_p2, %p2181_p13 }
  0x45   :  { %2191 = shalt.err (!%p2188_p3)
}
  0x46   :  { %32 = dma.hbm_to_vmem [thread:$0]  %s2697_s0, 128, %s30_s24, [#allocation3]  }
  0x47   :  { %s2192_s21 = scalar_lea.hbm %s2699_s2, 2048 }
  0x48   :  { %p2193_p4 = scmp.ne.s32.totalorder %s2699_s2, %s2192_s21  ;;  %p2196_p5 = scmp.lt.u32.totalorder %s2192_s21, %s2699_s2 }
  0x4a   :  { %p2198_p6 = pnand %p2196_p5, %p2193_p4 }
  0x4c   :  { %2201 = shalt.err (!%p2198_p6)
}
  0x4d   :  { %s2202_s1 = scalar_lea.vmem %s49_s26, 2048  ;;  %p2207_p8 = scmp.lt.s32.totalorder %s49_s26, %s49_s26 }
  0x4e   :  { %p2203_p7 = scmp.ne.s32.totalorder %s49_s26, %s2202_s1  ;;  %p2208_p9 = scmp.lt.s32.totalorder %s2202_s1, %s2202_s1 }
  0x50   :  { %p2209_p10 = por %p2208_p9, %p2207_p8 }
  0x52   :  { %p2210_p11 = pnand %p2209_p10, %p2203_p7 }
  0x54   :  { %2213 = shalt.err (!%p2210_p11)
}
  0x55   :  { %54 = dma.hbm_to_vmem [thread:$0]  %s2699_s2, 2048, %s49_s26, [#allocation6], %s2317_s22, %s2317_s22, %s2318_s27  }
  0x56   :  { %s2321_s28 = smov [#allocation10]   ;;  %s2322_s30 = smov [#allocation13]  }
  0x57   :  { %s74_s29 = sshll.u32 %s2321_s28, 4  ;;  %s100_s13 = sshll.u32 %s2322_s30, 4  ;;  %s75_s29 = int_to_ptr.vmem [resolvable:$true] %s74_s29  ;;  %s101_s13 = int_to_ptr.vmem [resolvable:$true] %s100_s13 }
  0x58   :  { %s2214_s6 = scalar_lea.hbm %s2702_s5, 2048 }
  0x59   :  { %p2215_p12 = scmp.ne.s32.totalorder %s2702_s5, %s2214_s6  ;;  %p2218_p13 = scmp.lt.u32.totalorder %s2214_s6, %s2702_s5 }
  0x5b   :  { %p2220_p0 = pnand %p2218_p13, %p2215_p12 }
  0x5d   :  { %2223 = shalt.err (!%p2220_p0)
}
  0x5e   :  { %s2224_s2 = scalar_lea.vmem %s75_s29, 2048  ;;  %p2229_p2 = scmp.lt.s32.totalorder %s75_s29, %s75_s29 }
  0x5f   :  { %p2225_p1 = scmp.ne.s32.totalorder %s75_s29, %s2224_s2  ;;  %p2230_p3 = scmp.lt.s32.totalorder %s2224_s2, %s2224_s2 }
  0x61   :  { %p2231_p4 = por %p2230_p3, %p2229_p2 }
  0x63   :  { %p2232_p5 = pnand %p2231_p4, %p2225_p1 }
  0x65   :  { %2235 = shalt.err (!%p2232_p5)
}
  0x66   :  { %80 = dma.hbm_to_vmem [thread:$0]  %s2702_s5, 2048, %s75_s29, [#allocation9], %s2317_s22, %s2317_s22, %s2318_s27  }
  0x67   :  { %s2236_s23 = scalar_lea.hbm %s2705_s8, 1024 }
  0x68   :  { %p2237_p6 = scmp.ne.s32.totalorder %s2705_s8, %s2236_s23  ;;  %p2240_p7 = scmp.lt.u32.totalorder %s2236_s23, %s2705_s8 }
  0x6a   :  { %p2242_p8 = pnand %p2240_p7, %p2237_p6 }
  0x6c   :  { %2245 = shalt.err (!%p2242_p8)
}
  0x6d   :  { %s2246_s28 = scalar_lea.vmem %s101_s13, 1024  ;;  %p2251_p10 = scmp.lt.s32.totalorder %s101_s13, %s101_s13 }
  0x6e   :  { %p2247_p9 = scmp.ne.s32.totalorder %s101_s13, %s2246_s28  ;;  %p2252_p11 = scmp.lt.s32.totalorder %s2246_s28, %s2246_s28 }
  0x70   :  { %p2253_p12 = por %p2252_p11, %p2251_p10 }
  0x72   :  { %p2254_p13 = pnand %p2253_p12, %p2247_p9 }
  0x74   :  { %2257 = shalt.err (!%p2254_p13)
}
  0x75   :  { %106 = dma.hbm_to_vmem [thread:$0]  %s2705_s8, 1024, %s101_s13, [#allocation12], %s2317_s22, %s2317_s22, %s2318_s27  }
  0x76   :  { %s2323_s30 = smov [#allocation14]   ;;  %s2258_s18 = scalar_lea.hbm %s2706_s9, 1024 }
  0x77   :  { %s112_s14 = sshll.u32 %s2323_s30, 4  ;;  %p2259_p0 = scmp.ne.s32.totalorder %s2706_s9, %s2258_s18  ;;  %s113_s14 = int_to_ptr.vmem [resolvable:$true] %s112_s14 }
  0x78   :  { %p2262_p1 = scmp.lt.u32.totalorder %s2258_s18, %s2706_s9 }
  0x7a   :  { %p2264_p2 = pnand %p2262_p1, %p2259_p0 }
  0x7c   :  { %2267 = shalt.err (!%p2264_p2)
}
  0x7d   :  { %s2268_s26 = scalar_lea.vmem %s113_s14, 1024  ;;  %p2273_p4 = scmp.lt.s32.totalorder %s113_s14, %s113_s14 }
  0x7e   :  { %p2269_p3 = scmp.ne.s32.totalorder %s113_s14, %s2268_s26  ;;  %p2274_p5 = scmp.lt.s32.totalorder %s2268_s26, %s2268_s26 }
  0x80   :  { %p2275_p6 = por %p2274_p5, %p2273_p4 }
  0x82   :  { %p2276_p7 = pnand %p2275_p6, %p2269_p3 }
  0x84   :  { %2279 = shalt.err (!%p2276_p7)
}
  0x85   :  { %118 = dma.hbm_to_vmem [thread:$0]  %s2706_s9, 1024, %s113_s14, [#allocation15], %s2317_s22, %s2317_s22, %s2318_s27  }
  0x86   :  { %2302 = dma.done.wait [#allocation3], 128  }
  0x87   :  { %2303 = vsyncadd [#allocation3], 4294967168 }
  0x88   :  { %2304 = dma.done.wait [#allocation6], 2176  }
  0x89   :  { %2305 = vsyncadd [#allocation6], 4294965120 }
  0x8a   :  { %2306 = dma.done.wait [#allocation9], 4096  }
  0x8b   :  { %2307 = vsyncadd [#allocation9], 4294963200 }
  0x8c   :  { %2308 = dma.done.wait [#allocation12], 3072  }
  0x8d   :  { %2309 = vsyncadd [#allocation12], 4294964224 }
  0x8e   :  { %2310 = dma.done.wait [#allocation15], 1024  }
  0x8f   :  { %2311 = vsyncadd [#allocation15], 4294966272  ;;  %v2324_v0 = vmov 0.0   ;;  %vm2325_vm0 = vmmov 0   ;;  %v2024_v1 = vld [vmem:[#allocation7] sm:$0xff]   ;;  %v2025_v2 = vld [vmem:[#allocation7 + $0x8] sm:$0xff]  }
  0x90   :  { %1711 = vmatprep.subr.bf16.mxu0 %v2324_v0  ;;  %1731 = vmatprep.subr.bf16.mxu1 %v2324_v0  ;;  %v2026_v3 = vld [vmem:[#allocation7 + $0x10] sm:$0xff]   ;;  %v2027_v4 = vld [vmem:[#allocation7 + $0x18] sm:$0xff]   ;;  %v2028_v5 = vld [vmem:[#allocation7 + $0x20] sm:$0xff]   ;;  %s2326_s1 = smov [#allocation16]  }
  0x91   :  { %1727 = vmatprep.mubr.msk.bf16.mxu0 %vm2325_vm0, %v2324_v0  ;;  %1747 = vmatprep.mubr.msk.bf16.mxu1 %vm2325_vm0, %v2324_v0  ;;  %v148_v6 = vld [vmem:[#allocation2] sm:$0xff]  ;;  %v2029_v8 = vld [vmem:[#allocation7 + $0x28] sm:$0xff]   ;;  %v2031_v12 = vld [vmem:[#allocation7 + $0x38] sm:$0xff]   ;;  %s1477_s0 = sshll.u32 %s2326_s1, 4  ;;  %s1478_s0 = int_to_ptr.vmem [resolvable:$true] %s1477_s0 }
  0x92   :  { %1712 = vmatpush3.bf16.msra.mxu0 %v2024_v1  ;;  %1732 = vmatpush3.bf16.msra.mxu1 %v2024_v1  ;;  %v2520_v7 = vpack.c.bf16 %v148_v6, %v148_v6  ;;  %v2030_v10 = vld [vmem:[#allocation7 + $0x30] sm:$0xff]   ;;  %v2032_v14 = vld [vmem:[#allocation8] sm:$0xff]   ;;  %v2034_v16 = vld [vmem:[#allocation8 + $0x8] sm:$0xff]   ;;  %s2280_s24 = scalar_lea.vmem %s1478_s0, 128  ;;  %p2285_p9 = scmp.lt.s32.totalorder %s1478_s0, %s1478_s0 }
  0x93   :  { %1713 = vmatprep.subr.bf16.mxu0 %v2324_v0  ;;  %1733 = vmatprep.subr.bf16.mxu1 %v2324_v0  ;;  %v2033_v15 = vld [vmem:[#allocation7 + $0x40] sm:$0xff]   ;;  %v2531_v17 = vld [vmem:[#allocation7 + $0x48] sm:$0xff]   ;;  %v2036_v18 = vld [vmem:[#allocation8 + $0x10] sm:$0xff]   ;;  %p2281_p8 = scmp.ne.s32.totalorder %s1478_s0, %s2280_s24  ;;  %p2286_p10 = scmp.lt.s32.totalorder %s2280_s24, %s2280_s24 }
  0x94   :  { %v182_v9 = vunpack.c.l.bf16 %v2520_v7  ;;  %v2037_v19 = vld [vmem:[#allocation7 + $0x50] sm:$0xff]   ;;  %v2038_v20 = vld [vmem:[#allocation8 + $0x18] sm:$0xff]   ;;  %v2040_v22 = vld [vmem:[#allocation8 + $0x20] sm:$0xff]  }
  0x95   :  { %v2039_v21 = vld [vmem:[#allocation7 + $0x58] sm:$0xff]   ;;  %v2041_v23 = vld [vmem:[#allocation7 + $0x60] sm:$0xff]   ;;  %v2042_v25 = vld [vmem:[#allocation8 + $0x28] sm:$0xff]   ;;  %p2287_p11 = por %p2286_p10, %p2285_p9 }
  0x96   :  { %1714 = vmatpush3.bf16.msra.mxu0 %v2025_v2  ;;  %1734 = vmatpush3.bf16.msra.mxu1 %v2025_v2  ;;  %v183_v11 = vsub.f32 %v148_v6, %v182_v9  ;;  %v402_v24 = vld [vmem:[#allocation5] sm:$0xff]  ;;  %v2043_v26 = vld [vmem:[#allocation7 + $0x68] sm:$0xff]   ;;  %v2044_v28 = vld [vmem:[#allocation8 + $0x30] sm:$0xff]  }
  0x97   :  { %1715 = vmatprep.subr.bf16.mxu0 %v2324_v0  ;;  %1735 = vmatprep.subr.bf16.mxu1 %v2324_v0  ;;  %v2547_v27 = vpack.c.bf16 %v402_v24, %v402_v24  ;;  %v2045_v29 = vld [vmem:[#allocation7 + $0x70] sm:$0xff]   ;;  %v2046_v31 = vld [vmem:[#allocation8 + $0x38] sm:$0xff]   ;;  %v2048_v34 = vld [vmem:[#allocation8 + $0x40] sm:$0xff]   ;;  %p2288_p12 = pnand %p2287_p11, %p2281_p8 }
  0x98   :  { %v184_v13 = vpack.c.bf16 %v183_v11, %v183_v11  ;;  %v2047_v32 = vld [vmem:[#allocation7 + $0x78] sm:$0xff]   ;;  %v2049_v36 = vld [vmem:[#allocation8 + $0x48] sm:$0xff]   ;;  %v2050_v37 = vld [vmem:[#allocation8 + $0x50] sm:$0xff]  }
  0x99   :  { %v438_v30 = vunpack.c.l.bf16 %v2547_v27  ;;  %v2051_v38 = vld [vmem:[#allocation8 + $0x58] sm:$0xff]   ;;  %v2052_v39 = vld [vmem:[#allocation8 + $0x60] sm:$0xff]   ;;  %v2053_v40 = vld [vmem:[#allocation8 + $0x68] sm:$0xff]  }
  0x9a   :  { %1716 = vmatpush3.bf16.msra.mxu0 %v2026_v3  ;;  %1736 = vmatpush3.bf16.msra.mxu1 %v2026_v3  ;;  %v2054_v41 = vld [vmem:[#allocation8 + $0x70] sm:$0xff]   ;;  %v2055_v42 = vld [vmem:[#allocation8 + $0x78] sm:$0xff]   ;;  %v2056_v43 = vld [vmem:[#allocation10] sm:$0xff]  }
  0x9b   :  { %1717 = vmatprep.subr.bf16.mxu0 %v2324_v0  ;;  %1737 = vmatprep.subr.bf16.mxu1 %v2324_v0  ;;  %v439_v33 = vsub.f32 %v402_v24, %v438_v30  ;;  %v2057_v44 = vld [vmem:[#allocation10 + $0x8] sm:$0xff]   ;;  %v2058_v45 = vld [vmem:[#allocation10 + $0x10] sm:$0xff]   ;;  %v2059_v46 = vld [vmem:[#allocation10 + $0x18] sm:$0xff]  }
  0x9c   :  { %v2060_v47 = vld [vmem:[#allocation10 + $0x20] sm:$0xff]   ;;  %v2061_v48 = vld [vmem:[#allocation10 + $0x28] sm:$0xff]   ;;  %v2062_v49 = vld [vmem:[#allocation10 + $0x30] sm:$0xff]  }
  0x9d   :  { %v440_v35 = vpack.c.bf16 %v439_v33, %v439_v33  ;;  %v2063_v50 = vld [vmem:[#allocation10 + $0x38] sm:$0xff]   ;;  %v2064_v24 = vld [vmem:[#allocation11] sm:$0xff]   ;;  %v2069_v30 = vld [vmem:[#allocation11 + $0x28] sm:$0xff]  }
  0x9e   :  { %1718 = vmatpush3.bf16.msra.mxu0 %v2027_v4  ;;  %1738 = vmatpush3.bf16.msra.mxu1 %v2027_v4  ;;  %v2072_v33 = vld [vmem:[#allocation10 + $0x40] sm:$0xff]  }
  0x9f   :  { %1719 = vmatprep.subr.bf16.mxu0 %v2324_v0  ;;  %1739 = vmatprep.subr.bf16.mxu1 %v2324_v0 }
  0xa2   :  { %1720 = vmatpush3.bf16.msra.mxu0 %v2028_v5  ;;  %1740 = vmatpush3.bf16.msra.mxu1 %v2028_v5 }
  0xa3   :  { %1721 = vmatprep.subr.bf16.mxu0 %v2324_v0  ;;  %1741 = vmatprep.subr.bf16.mxu1 %v2324_v0 }
  0xa6   :  { %1722 = vmatpush3.bf16.msra.mxu0 %v2029_v8  ;;  %1742 = vmatpush3.bf16.msra.mxu1 %v2029_v8 }
  0xa7   :  { %1723 = vmatprep.subr.bf16.mxu0 %v2324_v0  ;;  %1743 = vmatprep.subr.bf16.mxu1 %v2324_v0 }
  0xaa   :  { %1724 = vmatpush3.bf16.msra.mxu0 %v2030_v10  ;;  %1744 = vmatpush3.bf16.msra.mxu1 %v2030_v10 }
  0xab   :  { %1725 = vmatprep.subr.bf16.mxu0 %v2324_v0  ;;  %1745 = vmatprep.subr.bf16.mxu1 %v2324_v0 }
  0xae   :  { %1726 = vmatpush3.bf16.msra.mxu0 %v2031_v12  ;;  %1746 = vmatpush3.bf16.msra.mxu1 %v2031_v12 }
  0xaf   :  { %1751 = vmatprep.subr.bf16.mxu0 %v2324_v0  ;;  %1771 = vmatprep.subr.bf16.mxu1 %v2324_v0 }
  0xb1   :  { %1728 = vmatmul.mubr.bf16.vlgmr.msra.gmra.mrb[0].mxu0 %v184_v13  ;;  %1748 = vmatmul.mubr.bf16.vlgmr.msra.gmra.mrb[0].mxu1 %v2520_v7 }
  0xb2   :  { %1752 = vmatpush3.bf16.msra.mxu0 %v2032_v14  ;;  %1772 = vmatpush3.bf16.msra.mxu1 %v2033_v15 }
  0xb3   :  { %1753 = vmatprep.subr.bf16.mxu0 %v2324_v0  ;;  %1773 = vmatprep.subr.bf16.mxu1 %v2324_v0 }
  0xb4   :  { %1767 = vmatprep.mubr.msk.bf16.mxu0 %vm2325_vm0, %v2324_v0  ;;  %1787 = vmatprep.mubr.msk.bf16.mxu1 %vm2325_vm0, %v2324_v0 }
  0xb6   :  { %1754 = vmatpush3.bf16.msra.mxu0 %v2034_v16  ;;  %1774 = vmatpush3.bf16.msra.mxu1 %v2531_v17  ;;  %v1522_v16 = vld [vmem:[%s2701_s4] ss:$0 sm:$0xff] }
  0xb7   :  { %1755 = vmatprep.subr.bf16.mxu0 %v2324_v0  ;;  %1775 = vmatprep.subr.bf16.mxu1 %v2324_v0 }
  0xba   :  { %1756 = vmatpush3.bf16.msra.mxu0 %v2036_v18  ;;  %1776 = vmatpush3.bf16.msra.mxu1 %v2037_v19 }
  0xbb   :  { %1757 = vmatprep.subr.bf16.mxu0 %v2324_v0  ;;  %1777 = vmatprep.subr.bf16.mxu1 %v2324_v0 }
  0xbe   :  { %1758 = vmatpush3.bf16.msra.mxu0 %v2038_v20  ;;  %1778 = vmatpush3.bf16.msra.mxu1 %v2039_v21 }
  0xbf   :  { %1759 = vmatprep.subr.bf16.mxu0 %v2324_v0  ;;  %1779 = vmatprep.subr.bf16.mxu1 %v2324_v0 }
  0xc2   :  { %1760 = vmatpush3.bf16.msra.mxu0 %v2040_v22  ;;  %1780 = vmatpush3.bf16.msra.mxu1 %v2041_v23 }
  0xc3   :  { %1761 = vmatprep.subr.bf16.mxu0 %v2324_v0  ;;  %1781 = vmatprep.subr.bf16.mxu1 %v2324_v0 }
  0xc6   :  { %1762 = vmatpush3.bf16.msra.mxu0 %v2042_v25  ;;  %1782 = vmatpush3.bf16.msra.mxu1 %v2043_v26 }
  0xc7   :  { %1763 = vmatprep.subr.bf16.mxu0 %v2324_v0  ;;  %1783 = vmatprep.subr.bf16.mxu1 %v2324_v0 }
  0xca   :  { %1764 = vmatpush3.bf16.msra.mxu0 %v2044_v28  ;;  %1784 = vmatpush3.bf16.msra.mxu1 %v2045_v29  ;;  %v2067_v28 = vld [vmem:[#allocation11 + $0x18] sm:$0xff]  }
  0xcb   :  { %1765 = vmatprep.subr.bf16.mxu0 %v2324_v0  ;;  %1785 = vmatprep.subr.bf16.mxu1 %v2324_v0 }
  0xce   :  { %1766 = vmatpush3.bf16.msra.mxu0 %v2046_v31  ;;  %1786 = vmatpush3.bf16.msra.mxu1 %v2047_v32  ;;  %v2070_v31 = vld [vmem:[#allocation11 + $0x30] sm:$0xff]  }
  0xcf   :  { %1791 = vmatprep.subr.bf16.mxu0 %v2324_v0  ;;  %1811 = vmatprep.subr.bf16.mxu1 %v2324_v0 }
  0xd1   :  { %1768 = vmatmul.mubr.bf16.vlgmr.msra.gmra.mrb[4].mxu0 %v2520_v7  ;;  %1788 = vmatmul.mubr.bf16.vlgmr.msra.gmra.mrb[4].mxu1 %v440_v35  ;;  %v2074_v35 = vld [vmem:[#allocation10 + $0x50] sm:$0xff]  }
  0xd2   :  { %1792 = vmatpush3.bf16.msra.mxu0 %v2033_v15  ;;  %1812 = vmatpush3.bf16.msra.mxu1 %v2048_v34  ;;  %v2073_v34 = vld [vmem:[#allocation10 + $0x48] sm:$0xff]  }
  0xd3   :  { %1793 = vmatprep.subr.bf16.mxu0 %v2324_v0  ;;  %1813 = vmatprep.subr.bf16.mxu1 %v2324_v0 }
  0xd4   :  { %1807 = vmatprep.mubr.msk.bf16.mxu0 %vm2325_vm0, %v2324_v0  ;;  %1827 = vmatprep.mubr.msk.bf16.mxu1 %vm2325_vm0, %v2324_v0 }
  0xd6   :  { %1794 = vmatpush3.bf16.msra.mxu0 %v2531_v17  ;;  %1814 = vmatpush3.bf16.msra.mxu1 %v2049_v36  ;;  %v2075_v36 = vld [vmem:[#allocation10 + $0x58] sm:$0xff]  }
  0xd7   :  { %1795 = vmatprep.subr.bf16.mxu0 %v2324_v0  ;;  %1815 = vmatprep.subr.bf16.mxu1 %v2324_v0 }
  0xda   :  { %1796 = vmatpush3.bf16.msra.mxu0 %v2037_v19  ;;  %1816 = vmatpush3.bf16.msra.mxu1 %v2050_v37  ;;  %v2076_v37 = vld [vmem:[#allocation10 + $0x60] sm:$0xff]  }
  0xdb   :  { %1797 = vmatprep.subr.bf16.mxu0 %v2324_v0  ;;  %1817 = vmatprep.subr.bf16.mxu1 %v2324_v0 }
  0xde   :  { %1798 = vmatpush3.bf16.msra.mxu0 %v2039_v21  ;;  %1818 = vmatpush3.bf16.msra.mxu1 %v2051_v38  ;;  %v2077_v38 = vld [vmem:[#allocation10 + $0x68] sm:$0xff]  }
  0xdf   :  { %1799 = vmatprep.subr.bf16.mxu0 %v2324_v0  ;;  %1819 = vmatprep.subr.bf16.mxu1 %v2324_v0 }
  0xe2   :  { %1800 = vmatpush3.bf16.msra.mxu0 %v2041_v23  ;;  %1820 = vmatpush3.bf16.msra.mxu1 %v2052_v39  ;;  %v2078_v39 = vld [vmem:[#allocation10 + $0x70] sm:$0xff]  }
  0xe3   :  { %1801 = vmatprep.subr.bf16.mxu0 %v2324_v0  ;;  %1821 = vmatprep.subr.bf16.mxu1 %v2324_v0 }
  0xe6   :  { %1802 = vmatpush3.bf16.msra.mxu0 %v2043_v26  ;;  %1822 = vmatpush3.bf16.msra.mxu1 %v2053_v40  ;;  %v2065_v26 = vld [vmem:[#allocation11 + $0x8] sm:$0xff]   ;;  %v2079_v40 = vld [vmem:[#allocation10 + $0x78] sm:$0xff]  }
  0xe7   :  { %1803 = vmatprep.subr.bf16.mxu0 %v2324_v0  ;;  %1823 = vmatprep.subr.bf16.mxu1 %v2324_v0 }
  0xea   :  { %1804 = vmatpush3.bf16.msra.mxu0 %v2045_v29  ;;  %1824 = vmatpush3.bf16.msra.mxu1 %v2054_v41  ;;  %v2068_v29 = vld [vmem:[#allocation11 + $0x20] sm:$0xff]  }
  0xeb   :  { %1805 = vmatprep.subr.bf16.mxu0 %v2324_v0  ;;  %1825 = vmatprep.subr.bf16.mxu1 %v2324_v0 }
  0xee   :  { %1806 = vmatpush3.bf16.msra.mxu0 %v2047_v32  ;;  %1826 = vmatpush3.bf16.msra.mxu1 %v2055_v42  ;;  %v2071_v32 = vld [vmem:[#allocation11 + $0x38] sm:$0xff]  }
  0xef   :  { %1851 = vmatprep.subr.bf16.mxu1 %v2324_v0  ;;  %1831 = vmatprep.subr.bf16.mxu0 %v2324_v0 }
  0xf1   :  { %1808 = vmatmul.mubr.bf16.vlgmr.msra.gmra.mrb[8].mxu0 %v2547_v27  ;;  %1828 = vmatmul.mubr.bf16.vlgmr.msra.gmra.mrb[8].mxu1 %v2547_v27  ;;  %v2066_v27 = vld [vmem:[#allocation11 + $0x10] sm:$0xff]  }
  0xf2   :  { %1867 = vmatprep.mubr.msk.bf16.mxu1 %vm2325_vm0, %v2324_v0  ;;  %1847 = vmatprep.mubr.msk.bf16.mxu0 %vm2325_vm0, %v2324_v0 }
  0xf3   :  { %1852 = vmatpush3.bf16.msra.mxu1 %v2056_v43  ;;  %1832 = vmatpush3.bf16.msra.mxu0 %v2056_v43 }
  0xf4   :  { %1853 = vmatprep.subr.bf16.mxu1 %v2324_v0  ;;  %1833 = vmatprep.subr.bf16.mxu0 %v2324_v0 }
  0xf7   :  { %1854 = vmatpush3.bf16.msra.mxu1 %v2057_v44  ;;  %1834 = vmatpush3.bf16.msra.mxu0 %v2057_v44 }
  0xf8   :  { %1855 = vmatprep.subr.bf16.mxu1 %v2324_v0  ;;  %1835 = vmatprep.subr.bf16.mxu0 %v2324_v0 }
  0xfb   :  { %1856 = vmatpush3.bf16.msra.mxu1 %v2058_v45  ;;  %1836 = vmatpush3.bf16.msra.mxu0 %v2058_v45 }
  0xfc   :  { %1857 = vmatprep.subr.bf16.mxu1 %v2324_v0  ;;  %1837 = vmatprep.subr.bf16.mxu0 %v2324_v0 }
  0xff   :  { %1858 = vmatpush3.bf16.msra.mxu1 %v2059_v46  ;;  %1838 = vmatpush3.bf16.msra.mxu0 %v2059_v46 }
 0x100   :  { %1859 = vmatprep.subr.bf16.mxu1 %v2324_v0  ;;  %1839 = vmatprep.subr.bf16.mxu0 %v2324_v0 }
 0x103   :  { %1860 = vmatpush3.bf16.msra.mxu1 %v2060_v47  ;;  %1840 = vmatpush3.bf16.msra.mxu0 %v2060_v47 }
 0x104   :  { %1861 = vmatprep.subr.bf16.mxu1 %v2324_v0  ;;  %1841 = vmatprep.subr.bf16.mxu0 %v2324_v0 }
 0x107   :  { %1862 = vmatpush3.bf16.msra.mxu1 %v2061_v48  ;;  %1842 = vmatpush3.bf16.msra.mxu0 %v2061_v48 }
 0x108   :  { %1863 = vmatprep.subr.bf16.mxu1 %v2324_v0  ;;  %1843 = vmatprep.subr.bf16.mxu0 %v2324_v0 }
 0x10b   :  { %1864 = vmatpush3.bf16.msra.mxu1 %v2062_v49  ;;  %1844 = vmatpush3.bf16.msra.mxu0 %v2062_v49 }
 0x10c   :  { %1865 = vmatprep.subr.bf16.mxu1 %v2324_v0  ;;  %1845 = vmatprep.subr.bf16.mxu0 %v2324_v0 }
 0x10f   :  { %1866 = vmatpush3.bf16.msra.mxu1 %v2063_v50  ;;  %1846 = vmatpush3.bf16.msra.mxu0 %v2063_v50 }
 0x110   :  { %1871 = vmatprep.subr.bf16.mxu0 %v2324_v0  ;;  %1891 = vmatprep.subr.bf16.mxu1 %v2324_v0 }
 0x184   :  { %v267_v51 = vpop.f32.mrb[0].mxu0  ;;  %v307_v52 = vpop.f32.mrb[0].mxu1 }
 0x185   :  { %v308_v53 = vadd.f32 %v307_v52, %v267_v51  ;;  %v1729_v54 = vpop.f32.mrb[1].mxu0  ;;  %v1749_v55 = vpop.f32.mrb[1].mxu1  ;;  %v1539_v51 = vld [vmem:[%s2704_s7] ss:$0 sm:$0xff] }
 0x186   :  { %v270_v56 = vpop.f32.mrb[2].mxu0  ;;  %v310_v57 = vpop.f32.mrb[2].mxu1 }
 0x187   :  { %v1730_v58 = vpop.f32.mrb[3].mxu0  ;;  %v1750_v59 = vpop.f32.mrb[3].mxu1 }
 0x1a4   :  { %v395_v60 = vpop.f32.mrb[4].mxu0  ;;  %v523_v61 = vpop.f32.mrb[4].mxu1 }
 0x1a5   :  { %v401_v62 = vadd.f32 %v395_v60, %v308_v53  ;;  %v1769_v63 = vpop.f32.mrb[5].mxu0  ;;  %v1789_v1 = vpop.f32.mrb[5].mxu1 }
 0x1a6   :  { %v398_v2 = vpop.f32.mrb[6].mxu0  ;;  %v526_v3 = vpop.f32.mrb[6].mxu1  ;;  %v2081_v1 = vld [vmem:[#allocation11 + $0x48] sm:$0xff]  }
 0x1a7   :  { %v1770_v4 = vpop.f32.mrb[7].mxu0  ;;  %v1790_v5 = vpop.f32.mrb[7].mxu1  ;;  %v2082_v2 = vld [vmem:[#allocation11 + $0x50] sm:$0xff]   ;;  %v2083_v3 = vld [vmem:[#allocation11 + $0x58] sm:$0xff]  }
 0x1a8   :  { %v2084_v4 = vld [vmem:[#allocation11 + $0x60] sm:$0xff]   ;;  %v2085_v5 = vld [vmem:[#allocation11 + $0x68] sm:$0xff]  }
 0x1c4   :  { %v563_v6 = vpop.f32.mrb[8].mxu0  ;;  %v651_v7 = vpop.f32.mrb[8].mxu1 }
 0x1c5   :  { %v564_v8 = vadd.f32 %v563_v6, %v523_v61  ;;  %v1809_v9 = vpop.f32.mrb[9].mxu0  ;;  %v1829_v10 = vpop.f32.mrb[9].mxu1  ;;  %v2086_v6 = vld [vmem:[#allocation11 + $0x70] sm:$0xff]  }
 0x1c6   :  { %v566_v11 = vpop.f32.mrb[10].mxu0  ;;  %v654_v12 = vpop.f32.mrb[10].mxu1  ;;  %v2089_v9 = vld [vmem:[#allocation13 + $0x8] sm:$0xff]   ;;  %v2090_v10 = vld [vmem:[#allocation13 + $0x10] sm:$0xff]  }
 0x1c7   :  { %v657_v13 = vadd.f32 %v651_v7, %v564_v8  ;;  %v1810_v14 = vpop.f32.mrb[11].mxu0  ;;  %v1830_v15 = vpop.f32.mrb[11].mxu1  ;;  %v2087_v7 = vld [vmem:[#allocation11 + $0x78] sm:$0xff]   ;;  %v2088_v8 = vld [vmem:[#allocation13] sm:$0xff]  }
 0x1c8   :  { %v2091_v11 = vld [vmem:[#allocation13 + $0x18] sm:$0xff]   ;;  %v2092_v12 = vld [vmem:[#allocation13 + $0x20] sm:$0xff]   ;;  %v2094_v14 = vld [vmem:[#allocation13 + $0x30] sm:$0xff]  }
 0x1c9   :  { %v658_v17 = vadd.f32 %v657_v13, %v401_v62  ;;  %v2080_v62 = vld [vmem:[#allocation11 + $0x40] sm:$0xff]   ;;  %v2093_v13 = vld [vmem:[#allocation13 + $0x28] sm:$0xff]   ;;  %v2095_v15 = vld [vmem:[#allocation13 + $0x38] sm:$0xff]  }
 0x1cb   :  { %v666_v18 = vadd.f32 %v1522_v16, %v658_v17 }
 0x1cd   :  { %vm667_vm1 = vcmp.ge.f32.partialorder %v666_v18, 0.0  ;;  %v668_v19 = vmul.f32 0.01, %v666_v18 }
 0x1cf   :  { %v669_v20 = vsel %vm667_vm1, %v666_v18, %v668_v19 }
 0x1d0   :  { %v702_v21 = vpack.c.bf16 %v669_v20, %v669_v20 }
 0x1d2   :  { %1868 = vmatmul.mubr.bf16.vlgmr.msra.gmra.mrb[12].mxu1 %v702_v21  ;;  %v703_v22 = vunpack.c.l.bf16 %v702_v21 }
 0x1d3   :  { %1907 = vmatprep.mubr.msk.bf16.mxu1 %vm2325_vm0, %v2324_v0  ;;  %1892 = vmatpush3.bf16.msra.mxu1 %v2072_v33 }
 0x1d4   :  { %v704_v23 = vsub.f32 %v669_v20, %v703_v22  ;;  %1893 = vmatprep.subr.bf16.mxu1 %v2324_v0 }
 0x1d6   :  { %v705_v25 = vpack.c.bf16 %v704_v23, %v704_v23 }
 0x1d7   :  { %1894 = vmatpush3.bf16.msra.mxu1 %v2073_v34 }
 0x1d8   :  { %1848 = vmatmul.mubr.bf16.vlgmr.msra.gmra.mrb[12].mxu0 %v705_v25  ;;  %1895 = vmatprep.subr.bf16.mxu1 %v2324_v0 }
 0x1d9   :  { %1872 = vmatpush3.bf16.msra.mxu0 %v2064_v24  ;;  %1887 = vmatprep.mubr.msk.bf16.mxu0 %vm2325_vm0, %v2324_v0 }
 0x1da   :  { %1873 = vmatprep.subr.bf16.mxu0 %v2324_v0 }
 0x1db   :  { %1896 = vmatpush3.bf16.msra.mxu1 %v2074_v35 }
 0x1dc   :  { %1897 = vmatprep.subr.bf16.mxu1 %v2324_v0 }
 0x1dd   :  { %1874 = vmatpush3.bf16.msra.mxu0 %v2065_v26  ;;  %v1557_v26 = vld [vmem:[%s2704_s7 + $0x1] ss:$0 sm:$0xff] }
 0x1de   :  { %1875 = vmatprep.subr.bf16.mxu0 %v2324_v0 }
 0x1df   :  { %1898 = vmatpush3.bf16.msra.mxu1 %v2075_v36 }
 0x1e0   :  { %1899 = vmatprep.subr.bf16.mxu1 %v2324_v0 }
 0x1e1   :  { %1876 = vmatpush3.bf16.msra.mxu0 %v2066_v27 }
 0x1e2   :  { %1877 = vmatprep.subr.bf16.mxu0 %v2324_v0 }
 0x1e3   :  { %1900 = vmatpush3.bf16.msra.mxu1 %v2076_v37 }
 0x1e4   :  { %1901 = vmatprep.subr.bf16.mxu1 %v2324_v0 }
 0x1e5   :  { %1878 = vmatpush3.bf16.msra.mxu0 %v2067_v28 }
 0x1e6   :  { %1879 = vmatprep.subr.bf16.mxu0 %v2324_v0 }
 0x1e7   :  { %1902 = vmatpush3.bf16.msra.mxu1 %v2077_v38 }
 0x1e8   :  { %1903 = vmatprep.subr.bf16.mxu1 %v2324_v0 }
 0x1e9   :  { %1880 = vmatpush3.bf16.msra.mxu0 %v2068_v29 }
 0x1ea   :  { %1881 = vmatprep.subr.bf16.mxu0 %v2324_v0 }
 0x1eb   :  { %1904 = vmatpush3.bf16.msra.mxu1 %v2078_v39 }
 0x1ec   :  { %1905 = vmatprep.subr.bf16.mxu1 %v2324_v0 }
 0x1ed   :  { %1882 = vmatpush3.bf16.msra.mxu0 %v2069_v30 }
 0x1ee   :  { %1883 = vmatprep.subr.bf16.mxu0 %v2324_v0 }
 0x1ef   :  { %1906 = vmatpush3.bf16.msra.mxu1 %v2079_v40 }
 0x1f0   :  { %1931 = vmatprep.subr.bf16.mxu1 %v2324_v0 }
 0x1f1   :  { %1884 = vmatpush3.bf16.msra.mxu0 %v2070_v31 }
 0x1f2   :  { %1885 = vmatprep.subr.bf16.mxu0 %v2324_v0 }
 0x1f5   :  { %1886 = vmatpush3.bf16.msra.mxu0 %v2071_v32 }
 0x1f6   :  { %1911 = vmatprep.subr.bf16.mxu0 %v2324_v0 }
 0x1f8   :  { %1888 = vmatmul.mubr.bf16.vlgmr.msra.gmra.mrb[16].mxu0 %v702_v21 }
 0x1f9   :  { %1927 = vmatprep.mubr.msk.bf16.mxu0 %vm2325_vm0, %v2324_v0  ;;  %1912 = vmatpush3.bf16.msra.mxu0 %v2072_v33 }
 0x1fa   :  { %1913 = vmatprep.subr.bf16.mxu0 %v2324_v0 }
 0x1fd   :  { %1914 = vmatpush3.bf16.msra.mxu0 %v2073_v34 }
 0x1fe   :  { %1915 = vmatprep.subr.bf16.mxu0 %v2324_v0 }
 0x201   :  { %1916 = vmatpush3.bf16.msra.mxu0 %v2074_v35 }
 0x202   :  { %1917 = vmatprep.subr.bf16.mxu0 %v2324_v0 }
 0x205   :  { %1918 = vmatpush3.bf16.msra.mxu0 %v2075_v36 }
 0x206   :  { %1919 = vmatprep.subr.bf16.mxu0 %v2324_v0 }
 0x209   :  { %1920 = vmatpush3.bf16.msra.mxu0 %v2076_v37  ;;  %v2096_v37 = vld [vmem:[#allocation14] sm:$0xff]  }
 0x20a   :  { %1921 = vmatprep.subr.bf16.mxu0 %v2324_v0 }
 0x20d   :  { %1922 = vmatpush3.bf16.msra.mxu0 %v2077_v38 }
 0x20e   :  { %1923 = vmatprep.subr.bf16.mxu0 %v2324_v0 }
 0x211   :  { %1924 = vmatpush3.bf16.msra.mxu0 %v2078_v39  ;;  %v2097_v39 = vld [vmem:[#allocation14 + $0x8] sm:$0xff]  }
 0x212   :  { %1925 = vmatprep.subr.bf16.mxu0 %v2324_v0 }
 0x215   :  { %1926 = vmatpush3.bf16.msra.mxu0 %v2079_v40  ;;  %v2098_v40 = vld [vmem:[#allocation14 + $0x10] sm:$0xff]  }
 0x216   :  { %1951 = vmatprep.subr.bf16.mxu0 %v2324_v0 }
 0x2a5   :  { %v828_v41 = vpop.f32.mrb[12].mxu1 }
 0x2a6   :  { %v1869_v42 = vpop.f32.mrb[13].mxu1 }
 0x2a7   :  { %v831_v43 = vpop.f32.mrb[14].mxu1  ;;  %v2100_v42 = vld [vmem:[#allocation14 + $0x20] sm:$0xff]  }
 0x2a8   :  { %v1870_v44 = vpop.f32.mrb[15].mxu1  ;;  %v2101_v43 = vld [vmem:[#allocation14 + $0x28] sm:$0xff]  }
 0x2a9   :  { %v2102_v44 = vld [vmem:[#allocation14 + $0x30] sm:$0xff]  }
 0x2ab   :  { %v788_v45 = vpop.f32.mrb[12].mxu0 }
 0x2ac   :  { %v829_v46 = vadd.f32 %v828_v41, %v788_v45  ;;  %v1849_v47 = vpop.f32.mrb[13].mxu0  ;;  %v2099_v41 = vld [vmem:[#allocation14 + $0x18] sm:$0xff]  }
 0x2ad   :  { %v791_v48 = vpop.f32.mrb[14].mxu0  ;;  %v2103_v45 = vld [vmem:[#allocation14 + $0x38] sm:$0xff]  }
 0x2ae   :  { %v1850_v49 = vpop.f32.mrb[15].mxu0 }
 0x2cb   :  { %v916_v50 = vpop.f32.mrb[16].mxu0 }
 0x2cc   :  { %v922_v52 = vadd.f32 %v916_v50, %v829_v46  ;;  %v1889_v53 = vpop.f32.mrb[17].mxu0 }
 0x2cd   :  { %v919_v54 = vpop.f32.mrb[18].mxu0 }
 0x2ce   :  { %v930_v55 = vadd.f32 %v1539_v51, %v922_v52  ;;  %v1890_v56 = vpop.f32.mrb[19].mxu0 }
 0x2cf   :  { %v1574_v56 = vld [vmem:[%s2707_s10] ss:$0 sm:$0xff] }
 0x2d0   :  { %vm931_vm2 = vcmp.ge.f32.partialorder %v930_v55, 0.0  ;;  %v932_v57 = vmul.f32 0.01, %v930_v55 }
 0x2d2   :  { %v933_v58 = vsel %vm931_vm2, %v930_v55, %v932_v57 }
 0x2d3   :  { %v968_v59 = vpack.c.bf16 %v933_v58, %v933_v58 }
 0x2d5   :  { %1928 = vmatmul.mubr.bf16.vlgmr.msra.gmra.mrb[20].mxu0 %v968_v59  ;;  %v969_v60 = vunpack.c.l.bf16 %v968_v59 }
 0x2d6   :  { %1967 = vmatprep.mubr.msk.bf16.mxu0 %vm2325_vm0, %v2324_v0  ;;  %1952 = vmatpush3.bf16.msra.mxu0 %v2088_v8 }
 0x2d7   :  { %v970_v61 = vsub.f32 %v933_v58, %v969_v60  ;;  %1953 = vmatprep.subr.bf16.mxu0 %v2324_v0 }
 0x2d9   :  { %v971_v63 = vpack.c.bf16 %v970_v61, %v970_v61 }
 0x2da   :  { %1954 = vmatpush3.bf16.msra.mxu0 %v2089_v9 }
 0x2db   :  { %1908 = vmatmul.mubr.bf16.vlgmr.msra.gmra.mrb[16].mxu1 %v971_v63  ;;  %1955 = vmatprep.subr.bf16.mxu0 %v2324_v0 }
 0x2dc   :  { %1932 = vmatpush3.bf16.msra.mxu1 %v2080_v62  ;;  %1947 = vmatprep.mubr.msk.bf16.mxu1 %vm2325_vm0, %v2324_v0 }
 0x2dd   :  { %1933 = vmatprep.subr.bf16.mxu1 %v2324_v0 }
 0x2de   :  { %1956 = vmatpush3.bf16.msra.mxu0 %v2090_v10 }
 0x2df   :  { %1957 = vmatprep.subr.bf16.mxu0 %v2324_v0 }
 0x2e0   :  { %1934 = vmatpush3.bf16.msra.mxu1 %v2081_v1 }
 0x2e1   :  { %1935 = vmatprep.subr.bf16.mxu1 %v2324_v0 }
 0x2e2   :  { %1958 = vmatpush3.bf16.msra.mxu0 %v2091_v11 }
 0x2e3   :  { %1959 = vmatprep.subr.bf16.mxu0 %v2324_v0 }
 0x2e4   :  { %1936 = vmatpush3.bf16.msra.mxu1 %v2082_v2 }
 0x2e5   :  { %1937 = vmatprep.subr.bf16.mxu1 %v2324_v0 }
 0x2e6   :  { %1960 = vmatpush3.bf16.msra.mxu0 %v2092_v12 }
 0x2e7   :  { %1961 = vmatprep.subr.bf16.mxu0 %v2324_v0 }
 0x2e8   :  { %1938 = vmatpush3.bf16.msra.mxu1 %v2083_v3 }
 0x2e9   :  { %1939 = vmatprep.subr.bf16.mxu1 %v2324_v0 }
 0x2ea   :  { %1962 = vmatpush3.bf16.msra.mxu0 %v2093_v13 }
 0x2eb   :  { %1963 = vmatprep.subr.bf16.mxu0 %v2324_v0 }
 0x2ec   :  { %1940 = vmatpush3.bf16.msra.mxu1 %v2084_v4 }
 0x2ed   :  { %1941 = vmatprep.subr.bf16.mxu1 %v2324_v0 }
 0x2ee   :  { %1964 = vmatpush3.bf16.msra.mxu0 %v2094_v14 }
 0x2ef   :  { %1965 = vmatprep.subr.bf16.mxu0 %v2324_v0 }
 0x2f0   :  { %1942 = vmatpush3.bf16.msra.mxu1 %v2085_v5 }
 0x2f1   :  { %1943 = vmatprep.subr.bf16.mxu1 %v2324_v0 }
 0x2f2   :  { %1966 = vmatpush3.bf16.msra.mxu0 %v2095_v15 }
 0x2f3   :  { %1991 = vmatprep.subr.bf16.mxu0 %v2324_v0 }
 0x2f4   :  { %1944 = vmatpush3.bf16.msra.mxu1 %v2086_v6 }
 0x2f5   :  { %1945 = vmatprep.subr.bf16.mxu1 %v2324_v0 }
 0x2f8   :  { %1946 = vmatpush3.bf16.msra.mxu1 %v2087_v7 }
 0x2f9   :  { %1971 = vmatprep.subr.bf16.mxu1 %v2324_v0 }
 0x2fb   :  { %1948 = vmatmul.mubr.bf16.vlgmr.msra.gmra.mrb[20].mxu1 %v968_v59 }
 0x2fc   :  { %1987 = vmatprep.mubr.msk.bf16.mxu1 %vm2325_vm0, %v2324_v0  ;;  %1972 = vmatpush3.bf16.msra.mxu1 %v2088_v8 }
 0x2fd   :  { %1973 = vmatprep.subr.bf16.mxu1 %v2324_v0 }
 0x300   :  { %1974 = vmatpush3.bf16.msra.mxu1 %v2089_v9 }
 0x301   :  { %1975 = vmatprep.subr.bf16.mxu1 %v2324_v0 }
 0x304   :  { %1976 = vmatpush3.bf16.msra.mxu1 %v2090_v10 }
 0x305   :  { %1977 = vmatprep.subr.bf16.mxu1 %v2324_v0 }
 0x308   :  { %1978 = vmatpush3.bf16.msra.mxu1 %v2091_v11 }
 0x309   :  { %1979 = vmatprep.subr.bf16.mxu1 %v2324_v0 }
 0x30c   :  { %1980 = vmatpush3.bf16.msra.mxu1 %v2092_v12 }
 0x30d   :  { %1981 = vmatprep.subr.bf16.mxu1 %v2324_v0 }
 0x310   :  { %1982 = vmatpush3.bf16.msra.mxu1 %v2093_v13 }
 0x311   :  { %1983 = vmatprep.subr.bf16.mxu1 %v2324_v0 }
 0x314   :  { %1984 = vmatpush3.bf16.msra.mxu1 %v2094_v14 }
 0x315   :  { %1985 = vmatprep.subr.bf16.mxu1 %v2324_v0 }
 0x318   :  { %1986 = vmatpush3.bf16.msra.mxu1 %v2095_v15 }
 0x3a8   :  { %v1094_v16 = vpop.f32.mrb[20].mxu0 }
 0x3a9   :  { %v1929_v17 = vpop.f32.mrb[21].mxu0 }
 0x3aa   :  { %v1097_v18 = vpop.f32.mrb[22].mxu0 }
 0x3ab   :  { %v1930_v19 = vpop.f32.mrb[23].mxu0 }
 0x3ae   :  { %v1054_v20 = vpop.f32.mrb[16].mxu1 }
 0x3af   :  { %v1095_v21 = vadd.f32 %v1094_v16, %v1054_v20  ;;  %v1909_v22 = vpop.f32.mrb[17].mxu1 }
 0x3b0   :  { %v1057_v23 = vpop.f32.mrb[18].mxu1 }
 0x3b1   :  { %v1910_v24 = vpop.f32.mrb[19].mxu1 }
 0x3ce   :  { %v1182_v25 = vpop.f32.mrb[20].mxu1 }
 0x3cf   :  { %v1188_v27 = vadd.f32 %v1182_v25, %v1095_v21  ;;  %v1949_v28 = vpop.f32.mrb[21].mxu1 }
 0x3d0   :  { %v1185_v29 = vpop.f32.mrb[22].mxu1 }
 0x3d1   :  { %v1197_v30 = vadd.f32 %v1557_v26, %v1188_v27  ;;  %v1950_v31 = vpop.f32.mrb[23].mxu1 }
 0x3d3   :  { %vm1198_vm3 = vcmp.ge.f32.partialorder %v1197_v30, 0.0  ;;  %v1199_v32 = vmul.f32 0.01, %v1197_v30 }
 0x3d5   :  { %v1200_v33 = vsel %vm1198_vm3, %v1197_v30, %v1199_v32 }
 0x3d6   :  { %v1233_v34 = vpack.c.bf16 %v1200_v33, %v1200_v33 }
 0x3d8   :  { %1988 = vmatmul.mubr.bf16.vlgmr.msra.gmra.mrb[24].mxu1 %v1233_v34  ;;  %v1234_v35 = vunpack.c.l.bf16 %v1233_v34 }
 0x3da   :  { %v1235_v36 = vsub.f32 %v1200_v33, %v1234_v35 }
 0x3dc   :  { %v1236_v38 = vpack.c.bf16 %v1235_v36, %v1235_v36 }
 0x3de   :  { %1968 = vmatmul.mubr.bf16.vlgmr.msra.gmra.mrb[24].mxu0 %v1236_v38 }
 0x3df   :  { %1992 = vmatpush3.bf16.msra.mxu0 %v2096_v37  ;;  %2007 = vmatprep.mubr.msk.bf16.mxu0 %vm2325_vm0, %v2324_v0 }
 0x3e0   :  { %1993 = vmatprep.subr.bf16.mxu0 %v2324_v0 }
 0x3e3   :  { %1994 = vmatpush3.bf16.msra.mxu0 %v2097_v39 }
 0x3e4   :  { %1995 = vmatprep.subr.bf16.mxu0 %v2324_v0 }
 0x3e7   :  { %1996 = vmatpush3.bf16.msra.mxu0 %v2098_v40 }
 0x3e8   :  { %1997 = vmatprep.subr.bf16.mxu0 %v2324_v0 }
 0x3eb   :  { %1998 = vmatpush3.bf16.msra.mxu0 %v2099_v41 }
 0x3ec   :  { %1999 = vmatprep.subr.bf16.mxu0 %v2324_v0 }
 0x3ef   :  { %2000 = vmatpush3.bf16.msra.mxu0 %v2100_v42 }
 0x3f0   :  { %2001 = vmatprep.subr.bf16.mxu0 %v2324_v0 }
 0x3f3   :  { %2002 = vmatpush3.bf16.msra.mxu0 %v2101_v43 }
 0x3f4   :  { %2003 = vmatprep.subr.bf16.mxu0 %v2324_v0 }
 0x3f7   :  { %2004 = vmatpush3.bf16.msra.mxu0 %v2102_v44 }
 0x3f8   :  { %2005 = vmatprep.subr.bf16.mxu0 %v2324_v0  ;;  %v1575_v0 = vld [vmem:[%s2708_s11] ss:$0 sm:$0xff] }
 0x3fb   :  { %2006 = vmatpush3.bf16.msra.mxu0 %v2103_v45 }
 0x3fe   :  { %2008 = vmatmul.mubr.bf16.vlgmr.msra.gmra.mrb[28].mxu0 %v1233_v34 }
 0x4ab   :  { %v1359_v46 = vpop.f32.mrb[24].mxu1 }
 0x4ac   :  { %v1989_v47 = vpop.f32.mrb[25].mxu1 }
 0x4ad   :  { %v1362_v48 = vpop.f32.mrb[26].mxu1 }
 0x4ae   :  { %v1990_v49 = vpop.f32.mrb[27].mxu1 }
 0x4b1   :  { %v1319_v50 = vpop.f32.mrb[24].mxu0 }
 0x4b2   :  { %v1360_v51 = vadd.f32 %v1359_v46, %v1319_v50  ;;  %v1969_v52 = vpop.f32.mrb[25].mxu0 }
 0x4b3   :  { %v1322_v53 = vpop.f32.mrb[26].mxu0 }
 0x4b4   :  { %v1970_v54 = vpop.f32.mrb[27].mxu0 }
 0x4d1   :  { %v1447_v55 = vpop.f32.mrb[28].mxu0 }
 0x4d2   :  { %v1453_v57 = vadd.f32 %v1447_v55, %v1360_v51  ;;  %v2009_v58 = vpop.f32.mrb[29].mxu0 }
 0x4d3   :  { %v1450_v59 = vpop.f32.mrb[30].mxu0 }
 0x4d4   :  { %v1461_v60 = vadd.f32 %v1574_v56, %v1453_v57  ;;  %v2010_v61 = vpop.f32.mrb[31].mxu0 }
 0x4d6   :  { %v1469_v62 = vadd.f32 %v1575_v0, %v1461_v60 }
 0x4d8   :  { %1470 = vst [vmem:[#allocation16] sm:$0xff] %v1469_v62 }
 0x4d9   :  { %2291 = shalt.err (!%p2288_p12)
}
 0x4da   :  { %s2292_s5 = scalar_lea.hbm %s2709_s12, 128 }
 0x4db   :  { %p2293_p13 = scmp.ne.s32.totalorder %s2709_s12, %s2292_s5  ;;  %p2296_p0 = scmp.lt.u32.totalorder %s2292_s5, %s2709_s12 }
 0x4dd   :  { %p2298_p1 = pnand %p2296_p0, %p2293_p13 }
 0x4df   :  { %2301 = shalt.err (!%p2298_p1)
}
 0x4e0   :  { %1480 = dma.vmem_to_hbm [thread:$0]  %s1478_s0, 128, %s2709_s12, [#allocation4]  }
 0x4e1   :  { %2312 = dma.done.wait [#allocation4], 128  }
 0x4e2   :  { %2313 = vsyncadd [#allocation4], 4294967168 }
 0x4e3   :  { %1484 = vsyncpa [#allocation3], 1 }
 0x4e4   :  { %1485 = vsyncpa [#allocation6], 1 }
 0x4e5   :  { %1486 = vsyncpa [#allocation9], 1 }
 0x4e6   :  { %1487 = vsyncpa [#allocation12], 1 }
 0x4e7   :  { %1488 = vsyncpa [#allocation15], 1 }
 0x4e8   :  { %1489 = vsyncpa [#allocation4], 1 }

</bundles_post_ra>
